<compile_context>
chip_gen: v7x
topology: tpu7x:2x2x1
jax: 0.10.0
libtpu: 0.0.40
codegen_flags: <defaults>
</compile_context>

<pallas_src>
import functools
import math

import jax
import jax.numpy as jnp
from jax import lax
from jax.experimental import pallas as pl
from jax.experimental.pallas import tpu as pltpu


# ------------------------------ Pallas kernel -------------------------------

def fused_two_dim_attention_kernel(x_ref, r_ref, lqkv_ref, bqkv_ref,
                                   lout_ref, bout_ref, o_ref, *, C, H, W):
    """conv_q/k/v -> freq+time attention -> conv_output for one batch element.

    x_ref:    (3, C*H, W)      q, k, v inputs, channel-major rows (ci*H + h)
    r_ref:    (3, W, W)        column-shift operators (one per kx)
    lqkv_ref: (3, 3, C*H, C*H) row-shift + channel-mix operators per (slab, kx)
    bqkv_ref: (3, C*H, 1)      per-slab bias rows
    lout_ref: (3, C*H, 2*C*H)  output-conv operators per kx
    bout_ref: (C*H, 1)
    o_ref:    (C*H, W)
    """
    f32 = jnp.float32
    CH = C * H
    scale_f = 1.0 / math.sqrt(W)
    scale_t = 1.0 / math.sqrt(H)

    r = r_ref[...]                                              # (3, W, W)

    # ---- q/k/v 3x3 convs:  y_s = sum_kx L[s,kx] @ (x_s @ R[kx]) + b_s ----
    convs = []
    for s in range(3):
        xs = x_ref[s]                                           # (C*H, W)
        acc = bqkv_ref[s]                                       # (C*H, 1) -> bcast
        for kx in range(3):
            z = jnp.dot(xs, r[kx], preferred_element_type=f32)  # (C*H, W)
            acc = acc + jnp.dot(lqkv_ref[s, kx], z,
                                preferred_element_type=f32)     # (C*H, W)
        convs.append(acc)

    # (C*H, W) -> (C, H, W): sublane-tile-aligned split (layout no-op).
    q3 = convs[0].reshape(C, H, W)
    k3 = convs[1].reshape(C, H, W)
    v3 = convs[2].reshape(C, H, W)

    def softmax_last(sc):
        m = jnp.max(sc, axis=-1, keepdims=True)
        e = jnp.exp(sc - m)
        d = jnp.sum(e, axis=-1, keepdims=True)
        # approx=True would use the EUP fast reciprocal but loosens accuracy
        # past the 1e-4 check; the softmax width here is only 16.
        return e * pl.reciprocal(d, approx=False)

    # Frequency attention: scores over W, batched over channels.
    sf = jnp.einsum('chw,cgw->chg', q3 * scale_f, k3,
                    preferred_element_type=f32)                 # (C, H, H)
    att_f = jnp.einsum('chg,cgw->chw', softmax_last(sf), v3,
                       preferred_element_type=f32)              # (C, H, W)

    # Time attention: scores over H via a trans-LHS batched contraction
    # (no transposed conv slab, no in-kernel transposes).
    st = jnp.einsum('chw,chv->cwv', q3 * scale_t, k3,
                    preferred_element_type=f32)                 # (C, W, W)
    pt = softmax_last(st)
    # Output-side permute back to (C, H, W) folded into the contraction.
    att_t = jnp.einsum('chv,cwv->chw', v3, pt,
                       preferred_element_type=f32)              # (C, H, W)

    # ---- output 3x3 conv on the [att_time, att_freq] channel concat ----
    att2 = jnp.concatenate([att_t.reshape(CH, W), att_f.reshape(CH, W)],
                           axis=0)                              # (2*C*H, W)
    out = bout_ref[...]                                         # (C*H, 1) -> bcast
    for kx in range(3):
        z = jnp.dot(att2, r[kx], preferred_element_type=f32)    # (2*C*H, W)
        out = out + jnp.dot(lout_ref[kx], z, preferred_element_type=f32)
    o_ref[...] = out.astype(o_ref.dtype)


# ------------------- Host-side conv -> matmul operator prep ------------------

def _row_shift_operator(w_hwio, H):
    """(3,3,Cin,Cout) conv weight -> L: (3, Cout*H, Cin*H).

    L[kx] applied on the left of an (Cin*H, W) slab performs the ky (row)
    shifts (with zero padding) and the channel mixing for that kx column.
    """
    hidx = jnp.arange(H)
    # S[ky][h, hp] = 1 iff hp == h + ky - 1  (missing rows encode zero pad)
    S = jnp.stack(
        [(hidx[None, :] == hidx[:, None] + (ky - 1)).astype(jnp.float32)
         for ky in range(3)], axis=0)                           # (3, H, H)
    cin, cout = w_hwio.shape[2], w_hwio.shape[3]
    L = jnp.einsum('yxio,yhg->xohig', w_hwio.astype(jnp.float32), S)
    return L.reshape(3, cout * H, cin * H)


def _col_shift_operator(W):
    """R[kx]: right-multiplication shifts columns by kx-1 with zero padding."""
    widx = jnp.arange(W)
    return jnp.stack(
        [(widx[:, None] == widx[None, :] + (kx - 1)).astype(jnp.float32)
         for kx in range(3)], axis=0)                           # (3, W, W)


def _bias_rows(b, H):
    return jnp.repeat(b, H)[:, None]                            # (Cout*H, 1)


# ------------------------------- Entry point ---------------------------------

@jax.jit
def two_dim_attention(q, k, v, params):
    """Forward pass of TwoDimAttention. q, k, v: (B, C, H, W) float32."""
    B, C, H, W = q.shape
    CH = C * H

    # Contiguous host-side relayout only (free metadata reshape after stack).
    x_in = jnp.stack([q, k, v], axis=1).reshape(B, 3, CH, W)

    wq, bq = params['conv_q']
    wk, bk = params['conv_k']
    wv, bv = params['conv_v']
    wo, bo = params['conv_output']

    R = _col_shift_operator(W)                                  # (3, W, W)
    Lqkv = jnp.stack([_row_shift_operator(wq, H),
                      _row_shift_operator(wk, H),
                      _row_shift_operator(wv, H)], axis=0)      # (3, 3, CH, CH)
    bqkv = jnp.stack([_bias_rows(bq, H), _bias_rows(bk, H),
                      _bias_rows(bv, H)], axis=0)               # (3, CH, 1)
    Lout = _row_shift_operator(wo, H)                           # (3, CH, 2*CH)
    bout = _bias_rows(bo, H)                                    # (CH, 1)

    kern = functools.partial(fused_two_dim_attention_kernel, C=C, H=H, W=W)
    out = pl.pallas_call(
        kern,
        out_shape=jax.ShapeDtypeStruct((B, CH, W), q.dtype),
        grid=(B,),
        in_specs=[
            pl.BlockSpec((None, 3, CH, W), lambda b: (b, 0, 0, 0)),
            pl.BlockSpec((3, W, W), lambda b: (0, 0, 0)),
            pl.BlockSpec((3, 3, CH, CH), lambda b: (0, 0, 0, 0)),
            pl.BlockSpec((3, CH, 1), lambda b: (0, 0, 0)),
            pl.BlockSpec((3, CH, 2 * CH), lambda b: (0, 0, 0)),
            pl.BlockSpec((CH, 1), lambda b: (0, 0)),
        ],
        out_specs=pl.BlockSpec((None, CH, W), lambda b: (b, 0, 0)),
        compiler_params=pltpu.CompilerParams(
            dimension_semantics=("parallel",)),
    )(x_in, R, Lqkv, bqkv, Lout, bout)
    return out.reshape(B, C, H, W)


# --------------------------- Deterministic params ----------------------------

def init_conv_params(key, cin, cout):
    kw, kb = jax.random.split(key)
    bound = 1.0 / jnp.sqrt(jnp.float32(cin * 9))
    w = jax.random.uniform(kw, (3, 3, cin, cout), jnp.float32, -bound, bound)
    b = jax.random.uniform(kb, (cout,), jnp.float32, -bound, bound)
    return (w, b)


# ------------------------ Pure-JAX reference (check) -------------------------

def ref_conv(x_nchw, w_hwio, b):
    y = lax.conv_general_dilated(
        x_nchw, w_hwio, window_strides=(1, 1), padding='SAME',
        dimension_numbers=('NCHW', 'HWIO', 'NCHW'))
    return y + b[None, :, None, None]


def ref_sdpa(q, k, v):
    n = q.shape[-1]
    scores = jnp.einsum('bcmd,bcnd->bcmn', q, k) / jnp.sqrt(jnp.float32(n))
    w = jax.nn.softmax(scores, axis=-1)
    return jnp.einsum('bcmn,bcnd->bcmd', w, v)


def ref_forward(q, k, v, params):
    cq = ref_conv(q, *params['conv_q'])
    ck = ref_conv(k, *params['conv_k'])
    cv = ref_conv(v, *params['conv_v'])
    af = ref_sdpa(cq, ck, cv)
    at = jnp.transpose(
        ref_sdpa(jnp.transpose(cq, (0, 1, 3, 2)),
                 jnp.transpose(ck, (0, 1, 3, 2)),
                 jnp.transpose(cv, (0, 1, 3, 2))),
        (0, 1, 3, 2))
    a2d = jnp.concatenate([at, af], axis=1)
    return ref_conv(a2d, *params['conv_output'])


# ----------------------------------- Main ------------------------------------

if __name__ == "__main__":
    B, C, H, W = 2, 4, 16, 16
    key = jax.random.PRNGKey(0)
    kq, kk, kv, k1, k2, k3, k4 = jax.random.split(key, 7)

    q = jax.random.normal(kq, (B, C, H, W), jnp.float32)
    k = jax.random.normal(kk, (B, C, H, W), jnp.float32)
    v = jax.random.normal(kv, (B, C, H, W), jnp.float32)

    params = {
        'conv_q': init_conv_params(k1, C, C),
        'conv_k': init_conv_params(k2, C, C),
        'conv_v': init_conv_params(k3, C, C),
        'conv_output': init_conv_params(k4, 2 * C, C),
    }

    out = two_dim_attention(q, k, v, params)
    out = jax.block_until_ready(out)

    ref = ref_forward(q, k, v, params)
    assert out.shape == (B, C, H, W)
    assert jnp.allclose(out, ref, atol=1e-4, rtol=1e-4), "mismatch vs reference"

    print("KERNEL_OK")
</pallas_src>

<mosaic_0001>
module attributes {stable_mosaic.version = 11 : i64} {
  func.func @fused_two_dim_attention_kernel(%arg0: i32, %arg1: memref<1x3x64x16xf32, #tpu.memory_space<vmem>>, %arg2: memref<3x16x16xf32, #tpu.memory_space<vmem>>, %arg3: memref<3x3x64x64xf32, #tpu.memory_space<vmem>>, %arg4: memref<3x64x1xf32, #tpu.memory_space<vmem>>, %arg5: memref<3x64x128xf32, #tpu.memory_space<vmem>>, %arg6: memref<64x1xf32, #tpu.memory_space<vmem>>, %arg7: memref<1x64x16xf32, #tpu.memory_space<vmem>>) attributes {dimension_semantics = [#tpu.dimension_semantics<parallel>], iteration_bounds = array<i64: 2>, scalar_prefetch = 0 : i64, scratch_operands = 0 : i64, tpu.core_type = #tpu.core_type<tc>, window_params = [{transform_indices = @transform_0, window_bounds = array<i64: 1, 3, 64, 16>}, {pipeline_mode = #tpu.pipeline_mode<synchronous>, transform_indices = @transform_1, window_bounds = array<i64: 3, 16, 16>}, {pipeline_mode = #tpu.pipeline_mode<synchronous>, transform_indices = @transform_2, window_bounds = array<i64: 3, 3, 64, 64>}, {pipeline_mode = #tpu.pipeline_mode<synchronous>, transform_indices = @transform_3, window_bounds = array<i64: 3, 64, 1>}, {pipeline_mode = #tpu.pipeline_mode<synchronous>, transform_indices = @transform_4, window_bounds = array<i64: 3, 64, 128>}, {pipeline_mode = #tpu.pipeline_mode<synchronous>, transform_indices = @transform_5, window_bounds = array<i64: 64, 1>}, {transform_indices = @transform_6, window_bounds = array<i64: 1, 64, 16>}]} {
    %c0 = arith.constant 0 : index
    %c0_0 = arith.constant 0 : index
    %c0_1 = arith.constant 0 : index
    %0 = vector.load %arg2[%c0, %c0_0, %c0_1] : memref<3x16x16xf32, #tpu.memory_space<vmem>>, vector<3x16x16xf32>
    %c0_2 = arith.constant 0 : index
    %c0_3 = arith.constant 0 : index
    %c0_4 = arith.constant 0 : index
    %c0_5 = arith.constant 0 : index
    %1 = vector.load %arg1[%c0_2, %c0_3, %c0_4, %c0_5] : memref<1x3x64x16xf32, #tpu.memory_space<vmem>>, vector<1x1x64x16xf32>
    %2 = vector.shape_cast %1 : vector<1x1x64x16xf32> to vector<64x16xf32>
    %c0_6 = arith.constant 0 : index
    %c0_7 = arith.constant 0 : index
    %c0_8 = arith.constant 0 : index
    %3 = vector.load %arg4[%c0_6, %c0_7, %c0_8] : memref<3x64x1xf32, #tpu.memory_space<vmem>>, vector<1x64x1xf32>
    %4 = vector.shape_cast %3 : vector<1x64x1xf32> to vector<64x1xf32>
    %5 = vector.extract_strided_slice %0 {offsets = [0, 0, 0], sizes = [1, 16, 16], strides = [1, 1, 1]} : vector<3x16x16xf32> to vector<1x16x16xf32>
    %6 = vector.shape_cast %5 : vector<1x16x16xf32> to vector<16x16xf32>
    %cst = arith.constant dense<0.000000e+00> : vector<64x16xf32>
    %7 = tpu.matmul %2, %6, %cst {dimension_numbers = #tpu.dot_dimension_numbers<[1], [0], [0], [1], [0, 0, 1, 1], [], []>} : vector<64x16xf32>, vector<16x16xf32>, vector<64x16xf32> -> vector<64x16xf32>
    %c0_9 = arith.constant 0 : index
    %c0_10 = arith.constant 0 : index
    %c0_11 = arith.constant 0 : index
    %c0_12 = arith.constant 0 : index
    %8 = vector.load %arg3[%c0_9, %c0_10, %c0_11, %c0_12] : memref<3x3x64x64xf32, #tpu.memory_space<vmem>>, vector<1x1x64x64xf32>
    %9 = vector.shape_cast %8 : vector<1x1x64x64xf32> to vector<64x64xf32>
    %cst_13 = arith.constant dense<0.000000e+00> : vector<64x16xf32>
    %10 = tpu.matmul %9, %7, %cst_13 {dimension_numbers = #tpu.dot_dimension_numbers<[1], [0], [0], [1], [0, 0, 1, 1], [], []>} : vector<64x64xf32>, vector<64x16xf32>, vector<64x16xf32> -> vector<64x16xf32>
    %11 = vector.broadcast %4 : vector<64x1xf32> to vector<64x16xf32>
    %12 = arith.addf %11, %10 : vector<64x16xf32>
    %13 = vector.extract_strided_slice %0 {offsets = [1, 0, 0], sizes = [1, 16, 16], strides = [1, 1, 1]} : vector<3x16x16xf32> to vector<1x16x16xf32>
    %14 = vector.shape_cast %13 : vector<1x16x16xf32> to vector<16x16xf32>
    %cst_14 = arith.constant dense<0.000000e+00> : vector<64x16xf32>
    %15 = tpu.matmul %2, %14, %cst_14 {dimension_numbers = #tpu.dot_dimension_numbers<[1], [0], [0], [1], [0, 0, 1, 1], [], []>} : vector<64x16xf32>, vector<16x16xf32>, vector<64x16xf32> -> vector<64x16xf32>
    %c0_15 = arith.constant 0 : index
    %c1 = arith.constant 1 : index
    %c0_16 = arith.constant 0 : index
    %c0_17 = arith.constant 0 : index
    %16 = vector.load %arg3[%c0_15, %c1, %c0_16, %c0_17] : memref<3x3x64x64xf32, #tpu.memory_space<vmem>>, vector<1x1x64x64xf32>
    %17 = vector.shape_cast %16 : vector<1x1x64x64xf32> to vector<64x64xf32>
    %cst_18 = arith.constant dense<0.000000e+00> : vector<64x16xf32>
    %18 = tpu.matmul %17, %15, %cst_18 {dimension_numbers = #tpu.dot_dimension_numbers<[1], [0], [0], [1], [0, 0, 1, 1], [], []>} : vector<64x64xf32>, vector<64x16xf32>, vector<64x16xf32> -> vector<64x16xf32>
    %19 = arith.addf %12, %18 : vector<64x16xf32>
    %20 = vector.extract_strided_slice %0 {offsets = [2, 0, 0], sizes = [1, 16, 16], strides = [1, 1, 1]} : vector<3x16x16xf32> to vector<1x16x16xf32>
    %21 = vector.shape_cast %20 : vector<1x16x16xf32> to vector<16x16xf32>
    %cst_19 = arith.constant dense<0.000000e+00> : vector<64x16xf32>
    %22 = tpu.matmul %2, %21, %cst_19 {dimension_numbers = #tpu.dot_dimension_numbers<[1], [0], [0], [1], [0, 0, 1, 1], [], []>} : vector<64x16xf32>, vector<16x16xf32>, vector<64x16xf32> -> vector<64x16xf32>
    %c0_20 = arith.constant 0 : index
    %c2 = arith.constant 2 : index
    %c0_21 = arith.constant 0 : index
    %c0_22 = arith.constant 0 : index
    %23 = vector.load %arg3[%c0_20, %c2, %c0_21, %c0_22] : memref<3x3x64x64xf32, #tpu.memory_space<vmem>>, vector<1x1x64x64xf32>
    %24 = vector.shape_cast %23 : vector<1x1x64x64xf32> to vector<64x64xf32>
    %cst_23 = arith.constant dense<0.000000e+00> : vector<64x16xf32>
    %25 = tpu.matmul %24, %22, %cst_23 {dimension_numbers = #tpu.dot_dimension_numbers<[1], [0], [0], [1], [0, 0, 1, 1], [], []>} : vector<64x64xf32>, vector<64x16xf32>, vector<64x16xf32> -> vector<64x16xf32>
    %26 = arith.addf %19, %25 : vector<64x16xf32>
    %c0_24 = arith.constant 0 : index
    %c1_25 = arith.constant 1 : index
    %c0_26 = arith.constant 0 : index
    %c0_27 = arith.constant 0 : index
    %27 = vector.load %arg1[%c0_24, %c1_25, %c0_26, %c0_27] : memref<1x3x64x16xf32, #tpu.memory_space<vmem>>, vector<1x1x64x16xf32>
    %28 = vector.shape_cast %27 : vector<1x1x64x16xf32> to vector<64x16xf32>
    %c1_28 = arith.constant 1 : index
    %c0_29 = arith.constant 0 : index
    %c0_30 = arith.constant 0 : index
    %29 = vector.load %arg4[%c1_28, %c0_29, %c0_30] : memref<3x64x1xf32, #tpu.memory_space<vmem>>, vector<1x64x1xf32>
    %30 = vector.shape_cast %29 : vector<1x64x1xf32> to vector<64x1xf32>
    %31 = vector.extract_strided_slice %0 {offsets = [0, 0, 0], sizes = [1, 16, 16], strides = [1, 1, 1]} : vector<3x16x16xf32> to vector<1x16x16xf32>
    %32 = vector.shape_cast %31 : vector<1x16x16xf32> to vector<16x16xf32>
    %cst_31 = arith.constant dense<0.000000e+00> : vector<64x16xf32>
    %33 = tpu.matmul %28, %32, %cst_31 {dimension_numbers = #tpu.dot_dimension_numbers<[1], [0], [0], [1], [0, 0, 1, 1], [], []>} : vector<64x16xf32>, vector<16x16xf32>, vector<64x16xf32> -> vector<64x16xf32>
    %c1_32 = arith.constant 1 : index
    %c0_33 = arith.constant 0 : index
    %c0_34 = arith.constant 0 : index
    %c0_35 = arith.constant 0 : index
    %34 = vector.load %arg3[%c1_32, %c0_33, %c0_34, %c0_35] : memref<3x3x64x64xf32, #tpu.memory_space<vmem>>, vector<1x1x64x64xf32>
    %35 = vector.shape_cast %34 : vector<1x1x64x64xf32> to vector<64x64xf32>
    %cst_36 = arith.constant dense<0.000000e+00> : vector<64x16xf32>
    %36 = tpu.matmul %35, %33, %cst_36 {dimension_numbers = #tpu.dot_dimension_numbers<[1], [0], [0], [1], [0, 0, 1, 1], [], []>} : vector<64x64xf32>, vector<64x16xf32>, vector<64x16xf32> -> vector<64x16xf32>
    %37 = vector.broadcast %30 : vector<64x1xf32> to vector<64x16xf32>
    %38 = arith.addf %37, %36 : vector<64x16xf32>
    %39 = vector.extract_strided_slice %0 {offsets = [1, 0, 0], sizes = [1, 16, 16], strides = [1, 1, 1]} : vector<3x16x16xf32> to vector<1x16x16xf32>
    %40 = vector.shape_cast %39 : vector<1x16x16xf32> to vector<16x16xf32>
    %cst_37 = arith.constant dense<0.000000e+00> : vector<64x16xf32>
    %41 = tpu.matmul %28, %40, %cst_37 {dimension_numbers = #tpu.dot_dimension_numbers<[1], [0], [0], [1], [0, 0, 1, 1], [], []>} : vector<64x16xf32>, vector<16x16xf32>, vector<64x16xf32> -> vector<64x16xf32>
    %c1_38 = arith.constant 1 : index
    %c1_39 = arith.constant 1 : index
    %c0_40 = arith.constant 0 : index
    %c0_41 = arith.constant 0 : index
    %42 = vector.load %arg3[%c1_38, %c1_39, %c0_40, %c0_41] : memref<3x3x64x64xf32, #tpu.memory_space<vmem>>, vector<1x1x64x64xf32>
    %43 = vector.shape_cast %42 : vector<1x1x64x64xf32> to vector<64x64xf32>
    %cst_42 = arith.constant dense<0.000000e+00> : vector<64x16xf32>
    %44 = tpu.matmul %43, %41, %cst_42 {dimension_numbers = #tpu.dot_dimension_numbers<[1], [0], [0], [1], [0, 0, 1, 1], [], []>} : vector<64x64xf32>, vector<64x16xf32>, vector<64x16xf32> -> vector<64x16xf32>
    %45 = arith.addf %38, %44 : vector<64x16xf32>
    %46 = vector.extract_strided_slice %0 {offsets = [2, 0, 0], sizes = [1, 16, 16], strides = [1, 1, 1]} : vector<3x16x16xf32> to vector<1x16x16xf32>
    %47 = vector.shape_cast %46 : vector<1x16x16xf32> to vector<16x16xf32>
    %cst_43 = arith.constant dense<0.000000e+00> : vector<64x16xf32>
    %48 = tpu.matmul %28, %47, %cst_43 {dimension_numbers = #tpu.dot_dimension_numbers<[1], [0], [0], [1], [0, 0, 1, 1], [], []>} : vector<64x16xf32>, vector<16x16xf32>, vector<64x16xf32> -> vector<64x16xf32>
    %c1_44 = arith.constant 1 : index
    %c2_45 = arith.constant 2 : index
    %c0_46 = arith.constant 0 : index
    %c0_47 = arith.constant 0 : index
    %49 = vector.load %arg3[%c1_44, %c2_45, %c0_46, %c0_47] : memref<3x3x64x64xf32, #tpu.memory_space<vmem>>, vector<1x1x64x64xf32>
    %50 = vector.shape_cast %49 : vector<1x1x64x64xf32> to vector<64x64xf32>
    %cst_48 = arith.constant dense<0.000000e+00> : vector<64x16xf32>
    %51 = tpu.matmul %50, %48, %cst_48 {dimension_numbers = #tpu.dot_dimension_numbers<[1], [0], [0], [1], [0, 0, 1, 1], [], []>} : vector<64x64xf32>, vector<64x16xf32>, vector<64x16xf32> -> vector<64x16xf32>
    %52 = arith.addf %45, %51 : vector<64x16xf32>
    %c0_49 = arith.constant 0 : index
    %c2_50 = arith.constant 2 : index
    %c0_51 = arith.constant 0 : index
    %c0_52 = arith.constant 0 : index
    %53 = vector.load %arg1[%c0_49, %c2_50, %c0_51, %c0_52] : memref<1x3x64x16xf32, #tpu.memory_space<vmem>>, vector<1x1x64x16xf32>
    %54 = vector.shape_cast %53 : vector<1x1x64x16xf32> to vector<64x16xf32>
    %c2_53 = arith.constant 2 : index
    %c0_54 = arith.constant 0 : index
    %c0_55 = arith.constant 0 : index
    %55 = vector.load %arg4[%c2_53, %c0_54, %c0_55] : memref<3x64x1xf32, #tpu.memory_space<vmem>>, vector<1x64x1xf32>
    %56 = vector.shape_cast %55 : vector<1x64x1xf32> to vector<64x1xf32>
    %57 = vector.extract_strided_slice %0 {offsets = [0, 0, 0], sizes = [1, 16, 16], strides = [1, 1, 1]} : vector<3x16x16xf32> to vector<1x16x16xf32>
    %58 = vector.shape_cast %57 : vector<1x16x16xf32> to vector<16x16xf32>
    %cst_56 = arith.constant dense<0.000000e+00> : vector<64x16xf32>
    %59 = tpu.matmul %54, %58, %cst_56 {dimension_numbers = #tpu.dot_dimension_numbers<[1], [0], [0], [1], [0, 0, 1, 1], [], []>} : vector<64x16xf32>, vector<16x16xf32>, vector<64x16xf32> -> vector<64x16xf32>
    %c2_57 = arith.constant 2 : index
    %c0_58 = arith.constant 0 : index
    %c0_59 = arith.constant 0 : index
    %c0_60 = arith.constant 0 : index
    %60 = vector.load %arg3[%c2_57, %c0_58, %c0_59, %c0_60] : memref<3x3x64x64xf32, #tpu.memory_space<vmem>>, vector<1x1x64x64xf32>
    %61 = vector.shape_cast %60 : vector<1x1x64x64xf32> to vector<64x64xf32>
    %cst_61 = arith.constant dense<0.000000e+00> : vector<64x16xf32>
    %62 = tpu.matmul %61, %59, %cst_61 {dimension_numbers = #tpu.dot_dimension_numbers<[1], [0], [0], [1], [0, 0, 1, 1], [], []>} : vector<64x64xf32>, vector<64x16xf32>, vector<64x16xf32> -> vector<64x16xf32>
    %63 = vector.broadcast %56 : vector<64x1xf32> to vector<64x16xf32>
    %64 = arith.addf %63, %62 : vector<64x16xf32>
    %65 = vector.extract_strided_slice %0 {offsets = [1, 0, 0], sizes = [1, 16, 16], strides = [1, 1, 1]} : vector<3x16x16xf32> to vector<1x16x16xf32>
    %66 = vector.shape_cast %65 : vector<1x16x16xf32> to vector<16x16xf32>
    %cst_62 = arith.constant dense<0.000000e+00> : vector<64x16xf32>
    %67 = tpu.matmul %54, %66, %cst_62 {dimension_numbers = #tpu.dot_dimension_numbers<[1], [0], [0], [1], [0, 0, 1, 1], [], []>} : vector<64x16xf32>, vector<16x16xf32>, vector<64x16xf32> -> vector<64x16xf32>
    %c2_63 = arith.constant 2 : index
    %c1_64 = arith.constant 1 : index
    %c0_65 = arith.constant 0 : index
    %c0_66 = arith.constant 0 : index
    %68 = vector.load %arg3[%c2_63, %c1_64, %c0_65, %c0_66] : memref<3x3x64x64xf32, #tpu.memory_space<vmem>>, vector<1x1x64x64xf32>
    %69 = vector.shape_cast %68 : vector<1x1x64x64xf32> to vector<64x64xf32>
    %cst_67 = arith.constant dense<0.000000e+00> : vector<64x16xf32>
    %70 = tpu.matmul %69, %67, %cst_67 {dimension_numbers = #tpu.dot_dimension_numbers<[1], [0], [0], [1], [0, 0, 1, 1], [], []>} : vector<64x64xf32>, vector<64x16xf32>, vector<64x16xf32> -> vector<64x16xf32>
    %71 = arith.addf %64, %70 : vector<64x16xf32>
    %72 = vector.extract_strided_slice %0 {offsets = [2, 0, 0], sizes = [1, 16, 16], strides = [1, 1, 1]} : vector<3x16x16xf32> to vector<1x16x16xf32>
    %73 = vector.shape_cast %72 : vector<1x16x16xf32> to vector<16x16xf32>
    %cst_68 = arith.constant dense<0.000000e+00> : vector<64x16xf32>
    %74 = tpu.matmul %54, %73, %cst_68 {dimension_numbers = #tpu.dot_dimension_numbers<[1], [0], [0], [1], [0, 0, 1, 1], [], []>} : vector<64x16xf32>, vector<16x16xf32>, vector<64x16xf32> -> vector<64x16xf32>
    %c2_69 = arith.constant 2 : index
    %c2_70 = arith.constant 2 : index
    %c0_71 = arith.constant 0 : index
    %c0_72 = arith.constant 0 : index
    %75 = vector.load %arg3[%c2_69, %c2_70, %c0_71, %c0_72] : memref<3x3x64x64xf32, #tpu.memory_space<vmem>>, vector<1x1x64x64xf32>
    %76 = vector.shape_cast %75 : vector<1x1x64x64xf32> to vector<64x64xf32>
    %cst_73 = arith.constant dense<0.000000e+00> : vector<64x16xf32>
    %77 = tpu.matmul %76, %74, %cst_73 {dimension_numbers = #tpu.dot_dimension_numbers<[1], [0], [0], [1], [0, 0, 1, 1], [], []>} : vector<64x64xf32>, vector<64x16xf32>, vector<64x16xf32> -> vector<64x16xf32>
    %78 = arith.addf %71, %77 : vector<64x16xf32>
    %79 = vector.shape_cast %26 : vector<64x16xf32> to vector<4x16x16xf32>
    %80 = vector.shape_cast %52 : vector<64x16xf32> to vector<4x16x16xf32>
    %81 = vector.shape_cast %78 : vector<64x16xf32> to vector<4x16x16xf32>
    %cst_74 = arith.constant 2.500000e-01 : f32
    %82 = vector.broadcast %cst_74 : f32 to vector<4x16x16xf32>
    %83 = arith.mulf %79, %82 : vector<4x16x16xf32>
    "tpu.trace_start"() <{level = 10 : i32, message = "chw,cgw->chg"}> : () -> ()
    %cst_75 = arith.constant dense<0.000000e+00> : vector<4x16x16xf32>
    %84 = tpu.matmul %83, %80, %cst_75 {dimension_numbers = #tpu.dot_dimension_numbers<[2], [2], [1], [1], [0, 0, 0, 1, 1, 1], [0], [0]>} : vector<4x16x16xf32>, vector<4x16x16xf32>, vector<4x16x16xf32> -> vector<4x16x16xf32>
    "tpu.trace_stop"() : () -> ()
    %cst_76 = arith.constant dense<0xFF800000> : vector<4x16xf32>
    %85 = vector.multi_reduction <maximumf>, %84, %cst_76 [2] : vector<4x16x16xf32> to vector<4x16xf32>
    %86 = vector.shape_cast %85 : vector<4x16xf32> to vector<4x16x1xf32>
    %87 = vector.broadcast %86 : vector<4x16x1xf32> to vector<4x16x16xf32>
    %88 = arith.subf %84, %87 : vector<4x16x16xf32>
    %89 = math.exp %88 : vector<4x16x16xf32>
    %cst_77 = arith.constant dense<0.000000e+00> : vector<4x16xf32>
    %90 = vector.multi_reduction <add>, %89, %cst_77 [2] : vector<4x16x16xf32> to vector<4x16xf32>
    %91 = vector.shape_cast %90 : vector<4x16xf32> to vector<4x16x1xf32>
    %92 = tpu.reciprocal %91 : vector<4x16x1xf32> -> vector<4x16x1xf32>
    %93 = vector.broadcast %92 : vector<4x16x1xf32> to vector<4x16x16xf32>
    %94 = arith.mulf %89, %93 : vector<4x16x16xf32>
    "tpu.trace_start"() <{level = 10 : i32, message = "chg,cgw->chw"}> : () -> ()
    %cst_78 = arith.constant dense<0.000000e+00> : vector<4x16x16xf32>
    %95 = tpu.matmul %94, %81, %cst_78 {dimension_numbers = #tpu.dot_dimension_numbers<[2], [1], [1], [2], [0, 0, 0, 1, 1, 2], [0], [0]>} : vector<4x16x16xf32>, vector<4x16x16xf32>, vector<4x16x16xf32> -> vector<4x16x16xf32>
    "tpu.trace_stop"() : () -> ()
    %cst_79 = arith.constant 2.500000e-01 : f32
    %96 = vector.broadcast %cst_79 : f32 to vector<4x16x16xf32>
    %97 = arith.mulf %79, %96 : vector<4x16x16xf32>
    "tpu.trace_start"() <{level = 10 : i32, message = "chw,chv->cwv"}> : () -> ()
    %cst_80 = arith.constant dense<0.000000e+00> : vector<4x16x16xf32>
    %98 = tpu.matmul %97, %80, %cst_80 {dimension_numbers = #tpu.dot_dimension_numbers<[1], [1], [2], [2], [0, 0, 0, 2, 1, 2], [0], [0]>} : vector<4x16x16xf32>, vector<4x16x16xf32>, vector<4x16x16xf32> -> vector<4x16x16xf32>
    "tpu.trace_stop"() : () -> ()
    %cst_81 = arith.constant dense<0xFF800000> : vector<4x16xf32>
    %99 = vector.multi_reduction <maximumf>, %98, %cst_81 [2] : vector<4x16x16xf32> to vector<4x16xf32>
    %100 = vector.shape_cast %99 : vector<4x16xf32> to vector<4x16x1xf32>
    %101 = vector.broadcast %100 : vector<4x16x1xf32> to vector<4x16x16xf32>
    %102 = arith.subf %98, %101 : vector<4x16x16xf32>
    %103 = math.exp %102 : vector<4x16x16xf32>
    %cst_82 = arith.constant dense<0.000000e+00> : vector<4x16xf32>
    %104 = vector.multi_reduction <add>, %103, %cst_82 [2] : vector<4x16x16xf32> to vector<4x16xf32>
    %105 = vector.shape_cast %104 : vector<4x16xf32> to vector<4x16x1xf32>
    %106 = tpu.reciprocal %105 : vector<4x16x1xf32> -> vector<4x16x1xf32>
    %107 = vector.broadcast %106 : vector<4x16x1xf32> to vector<4x16x16xf32>
    %108 = arith.mulf %103, %107 : vector<4x16x16xf32>
    "tpu.trace_start"() <{level = 10 : i32, message = "chv,cwv->chw"}> : () -> ()
    %cst_83 = arith.constant dense<0.000000e+00> : vector<4x16x16xf32>
    %109 = tpu.matmul %81, %108, %cst_83 {dimension_numbers = #tpu.dot_dimension_numbers<[2], [2], [1], [1], [0, 0, 0, 1, 1, 1], [0], [0]>} : vector<4x16x16xf32>, vector<4x16x16xf32>, vector<4x16x16xf32> -> vector<4x16x16xf32>
    "tpu.trace_stop"() : () -> ()
    %110 = vector.shape_cast %109 : vector<4x16x16xf32> to vector<64x16xf32>
    %111 = vector.shape_cast %95 : vector<4x16x16xf32> to vector<64x16xf32>
    %112 = tpu.concatenate %110, %111 in 0 : vector<64x16xf32>, vector<64x16xf32> -> vector<128x16xf32>
    %c0_84 = arith.constant 0 : index
    %c0_85 = arith.constant 0 : index
    %113 = vector.load %arg6[%c0_84, %c0_85] : memref<64x1xf32, #tpu.memory_space<vmem>>, vector<64x1xf32>
    %114 = vector.extract_strided_slice %0 {offsets = [0, 0, 0], sizes = [1, 16, 16], strides = [1, 1, 1]} : vector<3x16x16xf32> to vector<1x16x16xf32>
    %115 = vector.shape_cast %114 : vector<1x16x16xf32> to vector<16x16xf32>
    %cst_86 = arith.constant dense<0.000000e+00> : vector<128x16xf32>
    %116 = tpu.matmul %112, %115, %cst_86 {dimension_numbers = #tpu.dot_dimension_numbers<[1], [0], [0], [1], [0, 0, 1, 1], [], []>} : vector<128x16xf32>, vector<16x16xf32>, vector<128x16xf32> -> vector<128x16xf32>
    %c0_87 = arith.constant 0 : index
    %c0_88 = arith.constant 0 : index
    %c0_89 = arith.constant 0 : index
    %117 = vector.load %arg5[%c0_87, %c0_88, %c0_89] : memref<3x64x128xf32, #tpu.memory_space<vmem>>, vector<1x64x128xf32>
    %118 = vector.shape_cast %117 : vector<1x64x128xf32> to vector<64x128xf32>
    %cst_90 = arith.constant dense<0.000000e+00> : vector<64x16xf32>
    %119 = tpu.matmul %118, %116, %cst_90 {dimension_numbers = #tpu.dot_dimension_numbers<[1], [0], [0], [1], [0, 0, 1, 1], [], []>} : vector<64x128xf32>, vector<128x16xf32>, vector<64x16xf32> -> vector<64x16xf32>
    %120 = vector.broadcast %113 : vector<64x1xf32> to vector<64x16xf32>
    %121 = arith.addf %120, %119 : vector<64x16xf32>
    %122 = vector.extract_strided_slice %0 {offsets = [1, 0, 0], sizes = [1, 16, 16], strides = [1, 1, 1]} : vector<3x16x16xf32> to vector<1x16x16xf32>
    %123 = vector.shape_cast %122 : vector<1x16x16xf32> to vector<16x16xf32>
    %cst_91 = arith.constant dense<0.000000e+00> : vector<128x16xf32>
    %124 = tpu.matmul %112, %123, %cst_91 {dimension_numbers = #tpu.dot_dimension_numbers<[1], [0], [0], [1], [0, 0, 1, 1], [], []>} : vector<128x16xf32>, vector<16x16xf32>, vector<128x16xf32> -> vector<128x16xf32>
    %c1_92 = arith.constant 1 : index
    %c0_93 = arith.constant 0 : index
    %c0_94 = arith.constant 0 : index
    %125 = vector.load %arg5[%c1_92, %c0_93, %c0_94] : memref<3x64x128xf32, #tpu.memory_space<vmem>>, vector<1x64x128xf32>
    %126 = vector.shape_cast %125 : vector<1x64x128xf32> to vector<64x128xf32>
    %cst_95 = arith.constant dense<0.000000e+00> : vector<64x16xf32>
    %127 = tpu.matmul %126, %124, %cst_95 {dimension_numbers = #tpu.dot_dimension_numbers<[1], [0], [0], [1], [0, 0, 1, 1], [], []>} : vector<64x128xf32>, vector<128x16xf32>, vector<64x16xf32> -> vector<64x16xf32>
    %128 = arith.addf %121, %127 : vector<64x16xf32>
    %129 = vector.extract_strided_slice %0 {offsets = [2, 0, 0], sizes = [1, 16, 16], strides = [1, 1, 1]} : vector<3x16x16xf32> to vector<1x16x16xf32>
    %130 = vector.shape_cast %129 : vector<1x16x16xf32> to vector<16x16xf32>
    %cst_96 = arith.constant dense<0.000000e+00> : vector<128x16xf32>
    %131 = tpu.matmul %112, %130, %cst_96 {dimension_numbers = #tpu.dot_dimension_numbers<[1], [0], [0], [1], [0, 0, 1, 1], [], []>} : vector<128x16xf32>, vector<16x16xf32>, vector<128x16xf32> -> vector<128x16xf32>
    %c2_97 = arith.constant 2 : index
    %c0_98 = arith.constant 0 : index
    %c0_99 = arith.constant 0 : index
    %132 = vector.load %arg5[%c2_97, %c0_98, %c0_99] : memref<3x64x128xf32, #tpu.memory_space<vmem>>, vector<1x64x128xf32>
    %133 = vector.shape_cast %132 : vector<1x64x128xf32> to vector<64x128xf32>
    %cst_100 = arith.constant dense<0.000000e+00> : vector<64x16xf32>
    %134 = tpu.matmul %133, %131, %cst_100 {dimension_numbers = #tpu.dot_dimension_numbers<[1], [0], [0], [1], [0, 0, 1, 1], [], []>} : vector<64x128xf32>, vector<128x16xf32>, vector<64x16xf32> -> vector<64x16xf32>
    %135 = arith.addf %128, %134 : vector<64x16xf32>
    %c0_101 = arith.constant 0 : index
    %c0_102 = arith.constant 0 : index
    %c0_103 = arith.constant 0 : index
    %136 = vector.load %arg7[%c0_101, %c0_102, %c0_103] : memref<1x64x16xf32, #tpu.memory_space<vmem>>, vector<1x64x16xf32>
    %137 = vector.shape_cast %136 : vector<1x64x16xf32> to vector<64x16xf32>
    %138 = vector.shape_cast %135 : vector<64x16xf32> to vector<1x64x16xf32>
    tpu.vector_store %arg7[%c0_101, %c0_102, %c0_103], %138 {strides = array<i32>} : memref<1x64x16xf32, #tpu.memory_space<vmem>>, vector<1x64x16xf32>,
    return
  }
  func.func @transform_0(%arg0: i32) -> (i32, i32, i32, i32) {
    %c0_i32 = arith.constant 0 : i32
    %c0_i32_0 = arith.constant 0 : i32
    %c0_i32_1 = arith.constant 0 : i32
    %c0_i32_2 = arith.constant 0 : i32
    return %arg0, %c0_i32, %c0_i32_0, %c0_i32_1 : i32, i32, i32, i32
  }
  func.func @transform_1(%arg0: i32) -> (i32, i32, i32) {
    %c0_i32 = arith.constant 0 : i32
    %c0_i32_0 = arith.constant 0 : i32
    %c0_i32_1 = arith.constant 0 : i32
    %c0_i32_2 = arith.constant 0 : i32
    return %c0_i32, %c0_i32_0, %c0_i32_1 : i32, i32, i32
  }
  func.func @transform_2(%arg0: i32) -> (i32, i32, i32, i32) {
    %c0_i32 = arith.constant 0 : i32
    %c0_i32_0 = arith.constant 0 : i32
    %c0_i32_1 = arith.constant 0 : i32
    %c0_i32_2 = arith.constant 0 : i32
    %c0_i32_3 = arith.constant 0 : i32
    return %c0_i32, %c0_i32_0, %c0_i32_1, %c0_i32_2 : i32, i32, i32, i32
  }
  func.func @transform_3(%arg0: i32) -> (i32, i32, i32) {
    %c0_i32 = arith.constant 0 : i32
    %c0_i32_0 = arith.constant 0 : i32
    %c0_i32_1 = arith.constant 0 : i32
    %c0_i32_2 = arith.constant 0 : i32
    return %c0_i32, %c0_i32_0, %c0_i32_1 : i32, i32, i32
  }
  func.func @transform_4(%arg0: i32) -> (i32, i32, i32) {
    %c0_i32 = arith.constant 0 : i32
    %c0_i32_0 = arith.constant 0 : i32
    %c0_i32_1 = arith.constant 0 : i32
    %c0_i32_2 = arith.constant 0 : i32
    return %c0_i32, %c0_i32_0, %c0_i32_1 : i32, i32, i32
  }
  func.func @transform_5(%arg0: i32) -> (i32, i32) {
    %c0_i32 = arith.constant 0 : i32
    %c0_i32_0 = arith.constant 0 : i32
    %c0_i32_1 = arith.constant 0 : i32
    return %c0_i32, %c0_i32_0 : i32, i32
  }
  func.func @transform_6(%arg0: i32) -> (i32, i32, i32) {
    %c0_i32 = arith.constant 0 : i32
    %c0_i32_0 = arith.constant 0 : i32
    %c0_i32_1 = arith.constant 0 : i32
    return %arg0, %c0_i32, %c0_i32_0 : i32, i32, i32
  }
}

</mosaic_0001>

<bundles_post_ra>
// kernel: two_dim_attention.1
= control target key start
LH: loop header
LB: loop body
LE: loop exit
PB: predicated region body
PF: predicated region fallthrough
CT: control target
= control target key end

     0   :  { %11 = vsyncpa [#allocation3], 0  ;;  %s8644_s0 = inlined_call_operand.vmem [shape: f32[2,3,64,16], index: 0, kind: input, shape index: {}]   ;;  %s8645_s1 = inlined_call_operand.vmem [shape: f32[3,16,16], index: 1, kind: input, shape index: {}]   ;;  %s8646_s2 = inlined_call_operand.vmem [shape: f32[3,3,64,64], index: 2, kind: input, shape index: {}]   ;;  %s8647_s3 = inlined_call_operand.vmem [shape: f32[3,64,1], index: 3, kind: input, shape index: {}]   ;;  %s8648_s4 = inlined_call_operand.vmem [shape: f32[3,64,128], index: 4, kind: input, shape index: {}]   ;;  %s8649_s5 = inlined_call_operand.vmem [shape: f32[64,1], index: 5, kind: input, shape index: {}]   ;;  %s8650_s6 = inlined_call_operand.hbm [shape: f32[2,64,16], index: 6, kind: output, shape index: {}]  }
   0x1   :  { %13 = vsyncpa [#allocation3 + $0x1], 0  ;;  %s7585_s21 = smov 0   ;;  %s7587_s22 = smov 0  }
   0x2   :  { %s7589_s23 = smov 0   ;;  %s7591_s24 = smov 0  }
   0x3 LB: > { %s7606_s25 = sadd.s32 4294967295, %s7544_s24   ;;  %s5396_s26 = sadd.s32 4294967294, %s7544_s24   ;;  %s7544_s24 = sphi %s7591_s24, %s8658_s24   ;;  %s7540_s23 = sphi %s7589_s23, %s8657_s23   ;;  %s7536_s22 = sphi %s7587_s22, %s8656_s22   ;;  %s7532_s21 = sphi %s7585_s21, %s8655_s21  }
   0x4   : > { %s7610_s27 = sadd.s32 1, %s7544_s24   ;;  %s157_s28 = sadd.s32 1, %s7540_s23 }
   0x5   : > { %s154_s29 = ssub.s32 %s7544_s24, %s7610_s27  ;;  %p167_p0 = scmp.ne.s32.totalorder %s7540_s23, %s7536_s22 }
   0x6   : > { %p155_p1 = scmp.eq.s32.totalorder %s154_s29, 0  ;;  %p168_p2 = scmp.eq.s32.totalorder %s7606_s25, 1 }
   0x7   : > { %p173_p3 = scmp.ne.s32.totalorder %s7536_s22, %s7532_s21  ;;  %p174_p4 = scmp.eq.s32.totalorder %s5396_s26, 1 }
   0x8   : > { %s7621_s30 = scalar_select %p155_p1, %s7540_s23, %s157_s28  }
   0x9   : > { %p7623_p5 = por %p168_p2, %p167_p0  ;;  %p7627_p6 = por %p174_p4, %p173_p3 }
   0xa   : > { %p5399_p7 = scmp.ge.s32.totalorder %s7544_s24, 1  ;;  %p215_p8 = scmp.lt.s32.totalorder %s7544_s24, 3 }
   0xc   : > { %p216_p9 = pnand %p5399_p7, %p215_p8 }
   0xd   : > { %v250_v0 = vld [vmem:[%s8645_s1] sm:$0xff] (!%p216_p9)  ;;  %v251_v1 = vld [vmem:[%s8645_s1 + $0x8] sm:$0xff] (!%p216_p9)  ;;  %p245_p10 = scmp.lt.s32.totalorder (!%p216_p9), %s7606_s25, 1  ;;  %v252_v2 = vld [vmem:[%s8645_s1 + $0x10] sm:$0xff] (!%p216_p9)  ;;  %vm272_vm0 = vcmask (!%p216_p9), 130048   ;;  %vm410_vm1 = vcmask (!%p216_p9), 523264  }
   0xe   : > { %219 = sbr.rel (%p216_p9) target bundleno = 2446 (0x98e), region = 44  ;;  %v7643_v3 = vpack.c.bf16 (!%p216_p9), %v251_v1, %v250_v0  ;;  %v253_v4 = vld [vmem:[%s8645_s1 + $0x18] sm:$0xff] (!%p216_p9)  ;;  %v254_v5 = vld [vmem:[%s8645_s1 + $0x20] sm:$0xff] (!%p216_p9)  ;;  %v255_v6 = vld [vmem:[%s8645_s1 + $0x28] sm:$0xff] (!%p216_p9)  ;;  %v7546_v36 = vmov (!%p216_p9), 0   ;;  %s242_s12 = sand.u32 (!%p216_p9), 1, %s7536_s22  }
   0xf   : > { %v7655_v7 = vpack.c.bf16 (!%p216_p9), %v253_v4, %v252_v2  ;;  %v7657_v8 = vpack.c.bf16 (!%p216_p9), %v255_v6, %v254_v5  ;;  %v402_v33 = vld [vmem:[%s8646_s2] sm:$0xff] (!%p216_p9)  ;;  %7417 = vset.pattern.permute.xlu1 (!%p216_p9), %v7546_v36  ;;  %7416 = vset.pattern.permute.xlu0 (!%p216_p9), %v7546_v36  ;;  %v5476_v37 = vld [vmem:[%s8647_s3 + $0x50] sm:$0xff] (!%p216_p9)  ;;  %v5475_v38 = vld [vmem:[%s8647_s3 + $0x48] sm:$0xff] (!%p216_p9)  ;;  %s5400_s13 = sshll.u32 (!%p216_p9), %s242_s12, 6  ;;  %s5759_s15 = sshll.u32 (!%p216_p9), %s7606_s25, 10 }
  0x10   : > { %6909 = vmatprep.subr.bf16.mxu1 (!%p216_p9), %v7643_v3  ;;  %v264_v34 = vld [vmem:[%s8647_s3] sm:$0xff] (!%p216_p9)  ;;  %v265_v39 = vld [vmem:[%s8647_s3 + $0x8] sm:$0xff] (!%p216_p9)  ;;  %v5477_v40 = vld [vmem:[%s8647_s3 + $0x58] sm:$0xff] (!%p216_p9)  ;;  %s244_s14 = scalar_lea.vmem (!%p216_p9), [#allocation2], %s5400_s13  ;;  %s8595_s19 = scalar_lea.hbm (!%p216_p9), %s8650_s6, %s5759_s15 }
  0x11   : > { %6911 = vmatpush3.bf16.msra.mxu1 (!%p216_p9), %v7643_v3  ;;  %6929 = vmatprep.subr.bf16.mxu0 (!%p216_p9), %v7655_v7  ;;  %v5474_v35 = vld [vmem:[%s8647_s3 + $0x40] sm:$0xff] (!%p216_p9)  ;;  %v5479_v41 = vld [vmem:[%s8647_s3 + $0x68] sm:$0xff] (!%p216_p9)  ;;  %v5480_v43 = vld [vmem:[%s8647_s3 + $0x70] sm:$0xff] (!%p216_p9)  ;;  %s5334_s16 = sshll.u32 (!%p216_p9), %s244_s14, 4  ;;  %s8597_s16 = int_to_ptr.vmem [resolvable:$true] %s5334_s16 }
  0x12   : > { %6931 = vmatpush3.bf16.msra.mxu0 (!%p216_p9), %v7655_v7  ;;  %542 = vperm.xlu1 (!%p216_p9), %7417, %v264_v34   ;;  %v5478_v42 = vld [vmem:[%s8647_s3 + $0x60] sm:$0xff] (!%p216_p9)  ;;  %v266_v44 = vld [vmem:[%s8647_s3 + $0x10] sm:$0xff] (!%p216_p9)  ;;  %v267_v51 = vld [vmem:[%s8647_s3 + $0x18] sm:$0xff] (!%p216_p9)  ;;  %s7482_s20 = scalar_lea.vmem (!%p216_p9), %s8597_s16, 1024 }
  0x13   : > { %6949 = vmatprep.subr.bf16.mxu0 (!%p216_p9), %v7657_v8  ;;  %1377 = vperm.xlu0 (!%p216_p9), %7416, %v5474_v35   ;;  %v5481_v52 = vld [vmem:[%s8647_s3 + $0x78] sm:$0xff] (!%p216_p9)  ;;  %v269_v59 = vld [vmem:[%s8647_s3 + $0x28] sm:$0xff] (!%p216_p9)  ;;  %v268_v60 = vld [vmem:[%s8647_s3 + $0x20] sm:$0xff] (!%p216_p9)  ;;  %p7483_p11 = scmp.ne.s32.totalorder (!%p216_p9), %s8597_s16, %s7482_s20 }
  0x14   : > { %v271_v4 = vld [vmem:[%s8647_s3 + $0x38] sm:$0xff] (!%p216_p9)  ;;  %v270_v5 = vld [vmem:[%s8647_s3 + $0x30] sm:$0xff] (!%p216_p9)  ;;  %v5427_v35 = vld [vmem:[%s8646_s2 + $0x48] sm:$0xff] (!%p216_p9) }
  0x15   : > { %s246_s26 = scalar_select %p245_p10, %s7606_s25, 1  ;;  %vm8124_vm2 = vmpackc.low %vm272_vm0, %vm272_vm0 }
  0x16   : > { %1387 = vperm.xlu1 %7417, %v5476_v37   ;;  %v5428_v37 = vld [vmem:[%s8646_s2 + $0x50] sm:$0xff]  ;;  %s8603_s25 = scalar_lea.sflag [#allocation3], %s242_s12  ;;  %p7484_p12 = pnand %p7483_p11, %p7623_p5 }
  0x17   : > { %s7372_s28 = smul.u32 192, %s246_s26  ;;  %1382 = vperm.xlu0 %7416, %v5475_v38   ;;  %s7547_s26 = smov [#allocation2]  }
  0x18   : > { %p7485_p13 = pneg %p7484_p12 }
  0x19   : > { %s7666_s10 = scalar_lea.vmem %s8644_s0, %s7372_s28  ;;  %s7486_s28 = sshll.u32 %s7547_s26, 4  ;;  %s7487_s28 = int_to_ptr.vmem [resolvable:$false] %s7486_s28 }
  0x1a   : > { %v256_v9 = vld [vmem:[%s7666_s10] sm:$0xff]  ;;  %v257_v10 = vld [vmem:[%s7666_s10 + $0x8] sm:$0xff]  ;;  %v258_v11 = vld [vmem:[%s7666_s10 + $0x10] sm:$0xff]  ;;  %547 = vperm.xlu1 %7417, %v265_v39   ;;  %s7488_s29 = scalar_lea.vmem %s7487_s28, 2048  ;;  %p7489_p0 = scmp.lt.s32.totalorder %s8597_s16, %s7487_s28 }
  0x1b   : > { %6188 = vmatprep.mubr.msk.f32.mxu1 %vm272_vm0, %v256_v9  ;;  %6232 = vmatprep.mubr.msk.f32.mxu0 %vm272_vm0, %v256_v9  ;;  %v259_v12 = vld [vmem:[%s7666_s10 + $0x18] sm:$0xff]  ;;  %v260_v13 = vld [vmem:[%s7666_s10 + $0x20] sm:$0xff]  ;;  %v261_v14 = vld [vmem:[%s7666_s10 + $0x28] sm:$0xff]  ;;  %p7490_p1 = scmp.lt.s32.totalorder %s7488_s29, %s7482_s20 }
  0x1c   : > { %6189 = vmatmul.mubr.msk.f32.vlgmr.msra.gmra.mrb[0].mxu1 %vm272_vm0, %v257_v10  ;;  %6233 = vmatmul.mubr.msk.f32.vlgmr.msra.gmra.mrb[0].mxu0 %vm272_vm0, %v257_v10  ;;  %v262_v15 = vld [vmem:[%s7666_s10 + $0x30] sm:$0xff]  ;;  %v263_v16 = vld [vmem:[%s7666_s10 + $0x38] sm:$0xff]  ;;  %v5466_v17 = vld [vmem:[%s7666_s10 + $0x40] sm:$0xff] }
  0x1d   : > { %6191 = vmatprep.mubr.msk.f32.mxu1 %vm272_vm0, %v258_v11  ;;  %6235 = vmatprep.mubr.msk.f32.mxu0 %vm272_vm0, %v258_v11  ;;  %v5467_v18 = vld [vmem:[%s7666_s10 + $0x48] sm:$0xff]  ;;  %v5468_v19 = vld [vmem:[%s7666_s10 + $0x50] sm:$0xff]  ;;  %v5469_v20 = vld [vmem:[%s7666_s10 + $0x58] sm:$0xff]  ;;  %p7491_p2 = por %p7490_p1, %p7489_p0 }
  0x1e   : > { %6951 = vmatpush3.bf16.msra.mxu0 %v7657_v8  ;;  %v5470_v21 = vld [vmem:[%s7666_s10 + $0x60] sm:$0xff]  ;;  %v5471_v22 = vld [vmem:[%s7666_s10 + $0x68] sm:$0xff]  ;;  %v5472_v23 = vld [vmem:[%s7666_s10 + $0x70] sm:$0xff]  ;;  %1392 = vperm.xlu0 %7416, %v5477_v40  }
  0x1f   : > { %6969 = vmatprep.subr.bf16.mxu0 %v7643_v3  ;;  %v5473_v24 = vld [vmem:[%s7666_s10 + $0x78] sm:$0xff]  ;;  %v5554_v25 = vld [vmem:[%s7666_s10 + $0x80] sm:$0xff]  ;;  %v5555_v26 = vld [vmem:[%s7666_s10 + $0x88] sm:$0xff]  ;;  %1402 = vperm.xlu1 %7417, %v5479_v41   ;;  %p7492_p3 = pnand %p7491_p2, %p7485_p13 }
  0x20   : > { %6192 = vmatmul.mubr.msk.f32.gmra.mrb[2].mxu1 %vm272_vm0, %v259_v12  ;;  %6236 = vmatmul.mubr.msk.f32.gmra.mrb[2].mxu0 %vm272_vm0, %v259_v12  ;;  %v5556_v27 = vld [vmem:[%s7666_s10 + $0x90] sm:$0xff]  ;;  %v5557_v28 = vld [vmem:[%s7666_s10 + $0x98] sm:$0xff]  ;;  %v5558_v29 = vld [vmem:[%s7666_s10 + $0xa0] sm:$0xff] }
  0x21   : > { %6194 = vmatprep.mubr.msk.f32.mxu1 %vm272_vm0, %v260_v13  ;;  %6238 = vmatprep.mubr.msk.f32.mxu0 %vm272_vm0, %v260_v13  ;;  %v5559_v30 = vld [vmem:[%s7666_s10 + $0xa8] sm:$0xff]  ;;  %v5560_v31 = vld [vmem:[%s7666_s10 + $0xb0] sm:$0xff]  ;;  %v5561_v32 = vld [vmem:[%s7666_s10 + $0xb8] sm:$0xff] }
  0x22   : > { %1397 = vperm.xlu0 %7416, %v5478_v42   ;;  %v5429_v40 = vld [vmem:[%s8646_s2 + $0x58] sm:$0xff]  ;;  %v5430_v42 = vld [vmem:[%s8646_s2 + $0x60] sm:$0xff] }
  0x23   : > { %1407 = vperm.xlu1 %7417, %v5480_v43  }
  0x24   : > { %6195 = vmatmul.mubr.msk.f32.gmra.mrb[4].mxu1 %vm272_vm0, %v261_v14  ;;  %6239 = vmatmul.mubr.msk.f32.gmra.mrb[4].mxu0 %vm272_vm0, %v261_v14 }
  0x25   : > { %6197 = vmatprep.mubr.msk.f32.mxu1 %vm272_vm0, %v262_v15  ;;  %6241 = vmatprep.mubr.msk.f32.mxu0 %vm272_vm0, %v262_v15 }
  0x26   : > { %552 = vperm.xlu0 %7416, %v266_v44  }
  0x27   : > { %557 = vperm.xlu1 %7417, %v267_v51  }
  0x28   : > { %6198 = vmatmul.mubr.msk.f32.gmra.mrb[6].mxu1 %vm272_vm0, %v263_v16  ;;  %6242 = vmatmul.mubr.msk.f32.gmra.mrb[6].mxu0 %vm272_vm0, %v263_v16 }
  0x29   : > { %6276 = vmatprep.mubr.msk.f32.mxu0 %vm272_vm0, %v256_v9  ;;  %6216 = vmatprep.mubr.msk.f32.mxu1 %vm410_vm1, %v402_v33 }
  0x2a   : > { %1412 = vperm.xlu0 %7416, %v5481_v52   ;;  %v5450_v52 = vld [vmem:[%s8646_s2 + $0x80] sm:$0xff] }
  0x2b   : > { %567 = vperm.xlu1 %7417, %v269_v59  }
  0x2c   : > { %6277 = vmatmul.mubr.msk.f32.vlgmr.msra.gmra.mrb[8].mxu0 %vm272_vm0, %v257_v10 }
  0x2d   : > { %6279 = vmatprep.mubr.msk.f32.mxu0 %vm272_vm0, %v258_v11  ;;  %6971 = vmatpush3.bf16.msra.mxu0 %v7643_v3 }
  0x2e   : > { %6989 = vmatprep.subr.bf16.mxu0 %v7655_v7  ;;  %562 = vperm.xlu0 %7416, %v268_v60   ;;  %v5453_v60 = vld [vmem:[%s8646_s2 + $0x98] sm:$0xff] }
  0x2f   : > { %577 = vperm.xlu1 %7417, %v271_v4   ;;  %v5456_v4 = vld [vmem:[%s8646_s2 + $0xb0] sm:$0xff] }
  0x30   : > { %6280 = vmatmul.mubr.msk.f32.gmra.mrb[10].mxu0 %vm272_vm0, %v259_v12 }
  0x31   : > { %6282 = vmatprep.mubr.msk.f32.mxu0 %vm272_vm0, %v260_v13 }
  0x32   : > { %572 = vperm.xlu0 %7416, %v270_v5  }
  0x34   : > { %6283 = vmatmul.mubr.msk.f32.gmra.mrb[12].mxu0 %vm272_vm0, %v261_v14 }
  0x35   : > { %6285 = vmatprep.mubr.msk.f32.mxu0 %vm272_vm0, %v262_v15  ;;  %v403_v15 = vld [vmem:[%s8646_s2 + $0x8] sm:$0xff] }
  0x38   : > { %6286 = vmatmul.mubr.msk.f32.gmra.mrb[14].mxu0 %vm272_vm0, %v263_v16 }
  0x39   : > { %6320 = vmatprep.mubr.msk.f32.mxu0 %vm272_vm0, %v5466_v17 }
  0x3c   : > { %6321 = vmatmul.mubr.msk.f32.vlgmr.msra.gmra.mrb[16].mxu0 %vm272_vm0, %v5467_v18 }
  0x3d   : > { %6323 = vmatprep.mubr.msk.f32.mxu0 %vm272_vm0, %v5468_v19  ;;  %6991 = vmatpush3.bf16.msra.mxu0 %v7655_v7 }
  0x3e   : > { %7009 = vmatprep.subr.bf16.mxu0 %v7657_v8 }
  0x40   : > { %6324 = vmatmul.mubr.msk.f32.gmra.mrb[18].mxu0 %vm272_vm0, %v5469_v20 }
  0x41   : > { %6326 = vmatprep.mubr.msk.f32.mxu0 %vm272_vm0, %v5470_v21 }
  0x44   : > { %6327 = vmatmul.mubr.msk.f32.gmra.mrb[20].mxu0 %vm272_vm0, %v5471_v22 }
  0x45   : > { %6329 = vmatprep.mubr.msk.f32.mxu0 %vm272_vm0, %v5472_v23 }
  0x48   : > { %6330 = vmatmul.mubr.msk.f32.gmra.mrb[22].mxu0 %vm272_vm0, %v5473_v24 }
  0x49   : > { %6364 = vmatprep.mubr.msk.f32.mxu0 %vm272_vm0, %v5466_v17 }
  0x4c   : > { %6365 = vmatmul.mubr.msk.f32.vlgmr.msra.gmra.mrb[24].mxu0 %vm272_vm0, %v5467_v18 }
  0x4d   : > { %6367 = vmatprep.mubr.msk.f32.mxu0 %vm272_vm0, %v5468_v19  ;;  %7011 = vmatpush3.bf16.msra.mxu0 %v7657_v8 }
  0x4e   : > { %7029 = vmatprep.subr.bf16.mxu0 %v7643_v3 }
  0x50   : > { %6368 = vmatmul.mubr.msk.f32.gmra.mrb[26].mxu0 %vm272_vm0, %v5469_v20 }
  0x51   : > { %6370 = vmatprep.mubr.msk.f32.mxu0 %vm272_vm0, %v5470_v21 }
  0x54   : > { %6371 = vmatmul.mubr.msk.f32.gmra.mrb[28].mxu0 %vm272_vm0, %v5471_v22 }
  0x55   : > { %6373 = vmatprep.mubr.msk.f32.mxu0 %vm272_vm0, %v5472_v23 }
  0x58   : > { %6374 = vmatmul.mubr.msk.f32.gmra.mrb[30].mxu0 %vm272_vm0, %v5473_v24 }
  0x59   : > { %6408 = vmatprep.mubr.msk.f32.mxu0 %vm272_vm0, %v5466_v17  ;;  %v404_v17 = vld [vmem:[%s8646_s2 + $0x10] sm:$0xff] }
  0x5c   : > { %6409 = vmatmul.mubr.msk.f32.vlgmr.msra.gmra.mrb[32].mxu0 %vm272_vm0, %v5467_v18 }
  0x5d   : > { %6411 = vmatprep.mubr.msk.f32.mxu0 %vm272_vm0, %v5468_v19  ;;  %7031 = vmatpush3.bf16.msra.mxu0 %v7643_v3 }
  0x5e   : > { %7049 = vmatprep.subr.bf16.mxu0 %v7655_v7 }
  0x60   : > { %6412 = vmatmul.mubr.msk.f32.gmra.mrb[34].mxu0 %vm272_vm0, %v5469_v20  ;;  %v405_v20 = vld [vmem:[%s8646_s2 + $0x18] sm:$0xff] }
  0x61   : > { %6414 = vmatprep.mubr.msk.f32.mxu0 %vm272_vm0, %v5470_v21 }
  0x64   : > { %6415 = vmatmul.mubr.msk.f32.gmra.mrb[36].mxu0 %vm272_vm0, %v5471_v22  ;;  %v406_v22 = vld [vmem:[%s8646_s2 + $0x20] sm:$0xff] }
  0x65   : > { %6417 = vmatprep.mubr.msk.f32.mxu0 %vm272_vm0, %v5472_v23 }
  0x68   : > { %6418 = vmatmul.mubr.msk.f32.gmra.mrb[38].mxu0 %vm272_vm0, %v5473_v24 }
  0x69   : > { %6452 = vmatprep.mubr.msk.f32.mxu0 %vm272_vm0, %v5554_v25 }
  0x6c   : > { %6453 = vmatmul.mubr.msk.f32.vlgmr.msra.gmra.mrb[40].mxu0 %vm272_vm0, %v5555_v26 }
  0x6d   : > { %7051 = vmatpush3.bf16.msra.mxu0 %v7655_v7  ;;  %6455 = vmatprep.mubr.msk.f32.mxu0 %vm272_vm0, %v5556_v27 }
  0x6e   : > { %7069 = vmatprep.subr.bf16.mxu0 %v7657_v8 }
  0x70   : > { %6456 = vmatmul.mubr.msk.f32.gmra.mrb[42].mxu0 %vm272_vm0, %v5557_v28 }
  0x71   : > { %6458 = vmatprep.mubr.msk.f32.mxu0 %vm272_vm0, %v5558_v29 }
  0x74   : > { %6459 = vmatmul.mubr.msk.f32.gmra.mrb[44].mxu0 %vm272_vm0, %v5559_v30 }
  0x75   : > { %6461 = vmatprep.mubr.msk.f32.mxu0 %vm272_vm0, %v5560_v31 }
  0x78   : > { %6462 = vmatmul.mubr.msk.f32.gmra.mrb[46].mxu0 %vm272_vm0, %v5561_v32 }
  0x79   : > { %6496 = vmatprep.mubr.msk.f32.mxu0 %vm272_vm0, %v5554_v25 }
  0x7c   : > { %6497 = vmatmul.mubr.msk.f32.vlgmr.msra.gmra.mrb[48].mxu0 %vm272_vm0, %v5555_v26 }
  0x7d   : > { %6499 = vmatprep.mubr.msk.f32.mxu0 %vm272_vm0, %v5556_v27  ;;  %7071 = vmatpush3.bf16.msra.mxu0 %v7657_v8 }
  0x80   : > { %6500 = vmatmul.mubr.msk.f32.gmra.mrb[50].mxu0 %vm272_vm0, %v5557_v28 }
  0x81   : > { %6502 = vmatprep.mubr.msk.f32.mxu0 %vm272_vm0, %v5558_v29 }
  0x84   : > { %6503 = vmatmul.mubr.msk.f32.gmra.mrb[52].mxu0 %vm272_vm0, %v5559_v30 }
  0x85   : > { %6505 = vmatprep.mubr.msk.f32.mxu0 %vm272_vm0, %v5560_v31 }
  0x88   : > { %6506 = vmatmul.mubr.msk.f32.gmra.mrb[54].mxu0 %vm272_vm0, %v5561_v32 }
  0x89   : > { %6540 = vmatprep.mubr.msk.f32.mxu0 %vm272_vm0, %v5554_v25  ;;  %v407_v25 = vld [vmem:[%s8646_s2 + $0x28] sm:$0xff] }
  0x8c   : > { %6541 = vmatmul.mubr.msk.f32.vlgmr.msra.gmra.mrb[56].mxu0 %vm272_vm0, %v5555_v26 }
  0x8d   : > { %6543 = vmatprep.mubr.msk.f32.mxu0 %vm272_vm0, %v5556_v27  ;;  %v408_v27 = vld [vmem:[%s8646_s2 + $0x30] sm:$0xff] }
  0x90   : > { %6544 = vmatmul.mubr.msk.f32.gmra.mrb[58].mxu0 %vm272_vm0, %v5557_v28 }
  0x91   : > { %6546 = vmatprep.mubr.msk.f32.mxu0 %vm272_vm0, %v5558_v29 }
  0x94   : > { %6547 = vmatmul.mubr.msk.f32.gmra.mrb[60].mxu0 %vm272_vm0, %v5559_v30  ;;  %v409_v30 = vld [vmem:[%s8646_s2 + $0x38] sm:$0xff] }
  0x95   : > { %6549 = vmatprep.mubr.msk.f32.mxu0 %vm272_vm0, %v5560_v31 }
  0x98   : > { %6550 = vmatmul.mubr.msk.f32.gmra.mrb[62].mxu0 %vm272_vm0, %v5561_v32  ;;  %v5426_v32 = vld [vmem:[%s8646_s2 + $0x40] sm:$0xff] }
  0xef   : > { %v6190_v45 = vpop.f32.mrb[0].mxu1  ;;  %v6234_v46 = vpop.f32.mrb[0].mxu0 }
  0xf0   : > { %v363_v47 = vpop.f32.mrb[1].mxu1  ;;  %v654_v48 = vpop.f32.mrb[1].mxu0 }
  0xf1   : > { %v6912_v49 = vpack.c.bf16 %v6190_v45, %v363_v47  ;;  %v6932_v50 = vpack.c.bf16 %v6234_v46, %v654_v48  ;;  %v5431_v45 = vld [vmem:[%s8646_s2 + $0x68] sm:$0xff]  ;;  %v5432_v47 = vld [vmem:[%s8646_s2 + $0x70] sm:$0xff] }
  0xf3   : > { %v6193_v53 = vpop.f32.mrb[2].mxu1  ;;  %6913 = vmatprep.subr.bf16.mxu1 %v6912_v49  ;;  %v6237_v54 = vpop.f32.mrb[2].mxu0 }
  0xf4   : > { %v373_v55 = vpop.f32.mrb[3].mxu1  ;;  %6915 = vmatpush3.bf16.msra.mxu1 %v6912_v49  ;;  %v664_v56 = vpop.f32.mrb[3].mxu0 }
  0xf5   : > { %v6916_v57 = vpack.c.bf16 %v6193_v53, %v373_v55  ;;  %v6936_v58 = vpack.c.bf16 %v6237_v54, %v664_v56  ;;  %v5451_v55 = vld [vmem:[%s8646_s2 + $0x88] sm:$0xff] }
  0xf7   : > { %v6196_v61 = vpop.f32.mrb[4].mxu1  ;;  %6917 = vmatprep.subr.bf16.mxu1 %v6916_v57  ;;  %v6240_v62 = vpop.f32.mrb[4].mxu0 }
  0xf8   : > { %v383_v63 = vpop.f32.mrb[5].mxu1  ;;  %6919 = vmatpush3.bf16.msra.mxu1 %v6916_v57  ;;  %v674_v0 = vpop.f32.mrb[5].mxu0  ;;  %v5452_v57 = vld [vmem:[%s8646_s2 + $0x90] sm:$0xff] }
  0xf9   : > { %v6920_v1 = vpack.c.bf16 %v6196_v61, %v383_v63  ;;  %v6940_v2 = vpack.c.bf16 %v6240_v62, %v674_v0  ;;  %v5454_v62 = vld [vmem:[%s8646_s2 + $0xa0] sm:$0xff] }
  0xfb   : > { %v6199_v6 = vpop.f32.mrb[6].mxu1  ;;  %6921 = vmatprep.subr.bf16.mxu1 %v6920_v1  ;;  %v6243_v9 = vpop.f32.mrb[6].mxu0 }
  0xfc   : > { %v393_v10 = vpop.f32.mrb[7].mxu1  ;;  %6923 = vmatpush3.bf16.msra.mxu1 %v6920_v1  ;;  %v684_v11 = vpop.f32.mrb[7].mxu0  ;;  %v5455_v1 = vld [vmem:[%s8646_s2 + $0xa8] sm:$0xff] }
  0xfd   : > { %v6924_v12 = vpack.c.bf16 %v6199_v6, %v393_v10  ;;  %v6944_v13 = vpack.c.bf16 %v6243_v9, %v684_v11  ;;  %v5457_v9 = vld [vmem:[%s8646_s2 + $0xb8] sm:$0xff]  ;;  %v5490_v11 = vld [vmem:[%s8646_s2 + $0xc0] sm:$0xff] }
  0xff   : > { %6925 = vmatprep.subr.bf16.mxu1 %v6924_v12  ;;  %v6278_v14 = vpop.f32.mrb[8].mxu0 }
 0x100   : > { %6927 = vmatpush3.bf16.msra.mxu1 %v6924_v12  ;;  %v905_v16 = vpop.f32.mrb[9].mxu0 }
 0x101   : > { %6933 = vmatprep.subr.bf16.mxu1 %v6932_v50  ;;  %v6952_v18 = vpack.c.bf16 %v6278_v14, %v905_v16  ;;  %v5491_v14 = vld [vmem:[%s8646_s2 + $0xc8] sm:$0xff]  ;;  %v5492_v16 = vld [vmem:[%s8646_s2 + $0xd0] sm:$0xff] }
 0x103   : > { %6217 = vmatmul.mubr.msk.f32.vlgmr.msra.gmra.mrb[8].mxu1 %vm410_vm1, %v403_v15  ;;  %v6281_v19 = vpop.f32.mrb[10].mxu0 }
 0x104   : > { %6935 = vmatpush3.bf16.msra.mxu1 %v6932_v50  ;;  %6219 = vmatprep.mubr.msk.f32.mxu1 %vm410_vm1, %v404_v17  ;;  %v915_v21 = vpop.f32.mrb[11].mxu0  ;;  %v5433_v50 = vld [vmem:[%s8646_s2 + $0x78] sm:$0xff] }
 0x105   : > { %6937 = vmatprep.subr.bf16.mxu1 %v6936_v58  ;;  %v6956_v23 = vpack.c.bf16 %v6281_v19, %v915_v21  ;;  %v5493_v19 = vld [vmem:[%s8646_s2 + $0xd8] sm:$0xff]  ;;  %v5494_v21 = vld [vmem:[%s8646_s2 + $0xe0] sm:$0xff] }
 0x107   : > { %6220 = vmatmul.mubr.msk.f32.gmra.mrb[10].mxu1 %vm410_vm1, %v405_v20  ;;  %v6284_v24 = vpop.f32.mrb[12].mxu0 }
 0x108   : > { %6939 = vmatpush3.bf16.msra.mxu1 %v6936_v58  ;;  %6222 = vmatprep.mubr.msk.f32.mxu1 %vm410_vm1, %v406_v22  ;;  %v925_v26 = vpop.f32.mrb[13].mxu0 }
 0x109   : > { %6941 = vmatprep.subr.bf16.mxu1 %v6940_v2  ;;  %v6960_v28 = vpack.c.bf16 %v6284_v24, %v925_v26  ;;  %v5495_v24 = vld [vmem:[%s8646_s2 + $0xe8] sm:$0xff]  ;;  %v5496_v26 = vld [vmem:[%s8646_s2 + $0xf0] sm:$0xff] }
 0x10b   : > { %6223 = vmatmul.mubr.msk.f32.gmra.mrb[12].mxu1 %vm410_vm1, %v407_v25  ;;  %v6287_v29 = vpop.f32.mrb[14].mxu0 }
 0x10c   : > { %6943 = vmatpush3.bf16.msra.mxu1 %v6940_v2  ;;  %6225 = vmatprep.mubr.msk.f32.mxu1 %vm410_vm1, %v408_v27  ;;  %v935_v31 = vpop.f32.mrb[15].mxu0 }
 0x10d   : > { %6945 = vmatprep.subr.bf16.mxu1 %v6944_v13  ;;  %v6964_v33 = vpack.c.bf16 %v6287_v29, %v935_v31  ;;  %v5497_v29 = vld [vmem:[%s8646_s2 + $0xf8] sm:$0xff]  ;;  %v5514_v31 = vld [vmem:[%s8646_s2 + $0x100] sm:$0xff] }
 0x10f   : > { %6226 = vmatmul.mubr.msk.f32.gmra.mrb[14].mxu1 %vm410_vm1, %v409_v30  ;;  %v6322_v34 = vpop.f32.mrb[16].mxu0 }
 0x110   : > { %6947 = vmatpush3.bf16.msra.mxu1 %v6944_v13  ;;  %6260 = vmatprep.mubr.msk.f32.mxu1 %vm410_vm1, %v5426_v32  ;;  %v1198_v36 = vpop.f32.mrb[17].mxu0 }
 0x111   : > { %6953 = vmatprep.subr.bf16.mxu1 %v6952_v18  ;;  %v6972_v38 = vpack.c.bf16 %v6322_v34, %v1198_v36  ;;  %v5516_v34 = vld [vmem:[%s8646_s2 + $0x110] sm:$0xff]  ;;  %v5517_v36 = vld [vmem:[%s8646_s2 + $0x118] sm:$0xff] }
 0x113   : > { %6261 = vmatmul.mubr.msk.f32.vlgmr.msra.gmra.mrb[8].mxu1 %vm410_vm1, %v5427_v35  ;;  %v6325_v39 = vpop.f32.mrb[18].mxu0 }
 0x114   : > { %6955 = vmatpush3.bf16.msra.mxu1 %v6952_v18  ;;  %6263 = vmatprep.mubr.msk.f32.mxu1 %vm410_vm1, %v5428_v37  ;;  %v1208_v41 = vpop.f32.mrb[19].mxu0 }
 0x115   : > { %6957 = vmatprep.subr.bf16.mxu1 %v6956_v23  ;;  %v6976_v43 = vpack.c.bf16 %v6325_v39, %v1208_v41  ;;  %v5519_v41 = vld [vmem:[%s8646_s2 + $0x128] sm:$0xff] }
 0x117   : > { %6264 = vmatmul.mubr.msk.f32.gmra.mrb[10].mxu1 %vm410_vm1, %v5429_v40  ;;  %v6328_v44 = vpop.f32.mrb[20].mxu0 }
 0x118   : > { %6959 = vmatpush3.bf16.msra.mxu1 %v6956_v23  ;;  %6266 = vmatprep.mubr.msk.f32.mxu1 %vm410_vm1, %v5430_v42  ;;  %v1218_v46 = vpop.f32.mrb[21].mxu0 }
 0x119   : > { %6961 = vmatprep.subr.bf16.mxu1 %v6960_v28  ;;  %v6980_v48 = vpack.c.bf16 %v6328_v44, %v1218_v46  ;;  %v5521_v46 = vld [vmem:[%s8646_s2 + $0x138] sm:$0xff] }
 0x11b   : > { %6267 = vmatmul.mubr.msk.f32.gmra.mrb[12].mxu1 %vm410_vm1, %v5431_v45  ;;  %v6331_v49 = vpop.f32.mrb[22].mxu0 }
 0x11c   : > { %6963 = vmatpush3.bf16.msra.mxu1 %v6960_v28  ;;  %6269 = vmatprep.mubr.msk.f32.mxu1 %vm410_vm1, %v5432_v47  ;;  %v1228_v51 = vpop.f32.mrb[23].mxu0 }
 0x11d   : > { %6965 = vmatprep.subr.bf16.mxu1 %v6964_v33  ;;  %v6984_v53 = vpack.c.bf16 %v6331_v49, %v1228_v51  ;;  %v5539_v51 = vld [vmem:[%s8646_s2 + $0x148] sm:$0xff] }
 0x11f   : > { %6270 = vmatmul.mubr.msk.f32.gmra.mrb[14].mxu1 %vm410_vm1, %v5433_v50  ;;  %v6366_v54 = vpop.f32.mrb[24].mxu0 }
 0x120   : > { %6967 = vmatpush3.bf16.msra.mxu1 %v6964_v33  ;;  %6304 = vmatprep.mubr.msk.f32.mxu1 %vm410_vm1, %v5450_v52  ;;  %v1489_v56 = vpop.f32.mrb[25].mxu0  ;;  %v5515_v33 = vld [vmem:[%s8646_s2 + $0x108] sm:$0xff] }
 0x121   : > { %6973 = vmatprep.subr.bf16.mxu1 %v6972_v38  ;;  %v6992_v58 = vpack.c.bf16 %v6366_v54, %v1489_v56  ;;  %v5541_v56 = vld [vmem:[%s8646_s2 + $0x158] sm:$0xff] }
 0x123   : > { %6305 = vmatmul.mubr.msk.f32.vlgmr.msra.gmra.mrb[8].mxu1 %vm410_vm1, %v5451_v55  ;;  %v6369_v59 = vpop.f32.mrb[26].mxu0 }
 0x124   : > { %6975 = vmatpush3.bf16.msra.mxu1 %v6972_v38  ;;  %6307 = vmatprep.mubr.msk.f32.mxu1 %vm410_vm1, %v5452_v57  ;;  %v1499_v61 = vpop.f32.mrb[27].mxu0  ;;  %v5518_v38 = vld [vmem:[%s8646_s2 + $0x120] sm:$0xff] }
 0x125   : > { %6977 = vmatprep.subr.bf16.mxu1 %v6976_v43  ;;  %v6996_v63 = vpack.c.bf16 %v6369_v59, %v1499_v61  ;;  %v5543_v61 = vld [vmem:[%s8646_s2 + $0x168] sm:$0xff] }
 0x127   : > { %6308 = vmatmul.mubr.msk.f32.gmra.mrb[10].mxu1 %vm410_vm1, %v5453_v60  ;;  %v6372_v0 = vpop.f32.mrb[28].mxu0 }
 0x128   : > { %6979 = vmatpush3.bf16.msra.mxu1 %v6976_v43  ;;  %6310 = vmatprep.mubr.msk.f32.mxu1 %vm410_vm1, %v5454_v62  ;;  %v1509_v2 = vpop.f32.mrb[29].mxu0  ;;  %v5520_v43 = vld [vmem:[%s8646_s2 + $0x130] sm:$0xff] }
 0x129   : > { %6981 = vmatprep.subr.bf16.mxu1 %v6980_v48  ;;  %v7000_v5 = vpack.c.bf16 %v6372_v0, %v1509_v2  ;;  %v5545_v2 = vld [vmem:[%s8646_s2 + $0x178] sm:$0xff] }
 0x12b   : > { %6311 = vmatmul.mubr.msk.f32.gmra.mrb[12].mxu1 %vm410_vm1, %v5455_v1  ;;  %v6375_v6 = vpop.f32.mrb[30].mxu0 }
 0x12c   : > { %6983 = vmatpush3.bf16.msra.mxu1 %v6980_v48  ;;  %6313 = vmatprep.mubr.msk.f32.mxu1 %vm410_vm1, %v5456_v4  ;;  %v1519_v10 = vpop.f32.mrb[31].mxu0  ;;  %v5538_v48 = vld [vmem:[%s8646_s2 + $0x140] sm:$0xff] }
 0x12d   : > { %6985 = vmatprep.subr.bf16.mxu1 %v6984_v53  ;;  %v7004_v12 = vpack.c.bf16 %v6375_v6, %v1519_v10  ;;  %v5579_v10 = vld [vmem:[%s8646_s2 + $0x188] sm:$0xff] }
 0x12f   : > { %6314 = vmatmul.mubr.msk.f32.gmra.mrb[14].mxu1 %vm410_vm1, %v5457_v9  ;;  %v6410_v13 = vpop.f32.mrb[32].mxu0 }
 0x130   : > { %6987 = vmatpush3.bf16.msra.mxu1 %v6984_v53  ;;  %6348 = vmatprep.mubr.msk.f32.mxu1 %vm410_vm1, %v5490_v11  ;;  %v1740_v15 = vpop.f32.mrb[33].mxu0  ;;  %v5540_v53 = vld [vmem:[%s8646_s2 + $0x150] sm:$0xff] }
 0x131   : > { %6993 = vmatprep.subr.bf16.mxu1 %v6992_v58  ;;  %v7012_v17 = vpack.c.bf16 %v6410_v13, %v1740_v15  ;;  %v5581_v15 = vld [vmem:[%s8646_s2 + $0x198] sm:$0xff] }
 0x133   : > { %6349 = vmatmul.mubr.msk.f32.vlgmr.msra.gmra.mrb[16].mxu1 %vm410_vm1, %v5491_v14  ;;  %v6413_v18 = vpop.f32.mrb[34].mxu0 }
 0x134   : > { %6995 = vmatpush3.bf16.msra.mxu1 %v6992_v58  ;;  %6351 = vmatprep.mubr.msk.f32.mxu1 %vm410_vm1, %v5492_v16  ;;  %v1750_v20 = vpop.f32.mrb[35].mxu0  ;;  %v5542_v58 = vld [vmem:[%s8646_s2 + $0x160] sm:$0xff] }
 0x135   : > { %6997 = vmatprep.subr.bf16.mxu1 %v6996_v63  ;;  %v7016_v22 = vpack.c.bf16 %v6413_v18, %v1750_v20  ;;  %v5583_v20 = vld [vmem:[%s8646_s2 + $0x1a8] sm:$0xff] }
 0x137   : > { %6352 = vmatmul.mubr.msk.f32.gmra.mrb[18].mxu1 %vm410_vm1, %v5493_v19  ;;  %v6416_v23 = vpop.f32.mrb[36].mxu0 }
 0x138   : > { %6999 = vmatpush3.bf16.msra.mxu1 %v6996_v63  ;;  %6354 = vmatprep.mubr.msk.f32.mxu1 %vm410_vm1, %v5494_v21  ;;  %v1760_v25 = vpop.f32.mrb[37].mxu0  ;;  %v5544_v63 = vld [vmem:[%s8646_s2 + $0x170] sm:$0xff] }
 0x139   : > { %7001 = vmatprep.subr.bf16.mxu1 %v7000_v5  ;;  %v7020_v27 = vpack.c.bf16 %v6416_v23, %v1760_v25  ;;  %v5585_v25 = vld [vmem:[%s8646_s2 + $0x1b8] sm:$0xff] }
 0x13b   : > { %6355 = vmatmul.mubr.msk.f32.gmra.mrb[20].mxu1 %vm410_vm1, %v5495_v24  ;;  %v6419_v28 = vpop.f32.mrb[38].mxu0 }
 0x13c   : > { %7003 = vmatpush3.bf16.msra.mxu1 %v7000_v5  ;;  %6357 = vmatprep.mubr.msk.f32.mxu1 %vm410_vm1, %v5496_v26  ;;  %v1770_v30 = vpop.f32.mrb[39].mxu0  ;;  %v5578_v5 = vld [vmem:[%s8646_s2 + $0x180] sm:$0xff] }
 0x13d   : > { %7005 = vmatprep.subr.bf16.mxu1 %v7004_v12  ;;  %v7024_v32 = vpack.c.bf16 %v6419_v28, %v1770_v30  ;;  %v5603_v30 = vld [vmem:[%s8646_s2 + $0x1c8] sm:$0xff] }
 0x13f   : > { %6358 = vmatmul.mubr.msk.f32.gmra.mrb[22].mxu1 %vm410_vm1, %v5497_v29  ;;  %v6454_v35 = vpop.f32.mrb[40].mxu0 }
 0x140   : > { %7007 = vmatpush3.bf16.msra.mxu1 %v7004_v12  ;;  %6392 = vmatprep.mubr.msk.f32.mxu1 %vm410_vm1, %v5514_v31  ;;  %v2033_v37 = vpop.f32.mrb[41].mxu0  ;;  %v5580_v12 = vld [vmem:[%s8646_s2 + $0x190] sm:$0xff] }
 0x141   : > { %7013 = vmatprep.subr.bf16.mxu1 %v7012_v17  ;;  %v7032_v39 = vpack.c.bf16 %v6454_v35, %v2033_v37  ;;  %v5606_v35 = vld [vmem:[%s8646_s2 + $0x1e0] sm:$0xff]  ;;  %v5608_v37 = vld [vmem:[%s8646_s2 + $0x1f0] sm:$0xff] }
 0x143   : > { %6393 = vmatmul.mubr.msk.f32.vlgmr.msra.gmra.mrb[16].mxu1 %vm410_vm1, %v5515_v33  ;;  %v6457_v40 = vpop.f32.mrb[42].mxu0 }
 0x144   : > { %7015 = vmatpush3.bf16.msra.mxu1 %v7012_v17  ;;  %6395 = vmatprep.mubr.msk.f32.mxu1 %vm410_vm1, %v5516_v34  ;;  %v2043_v42 = vpop.f32.mrb[43].mxu0  ;;  %v5582_v17 = vld [vmem:[%s8646_s2 + $0x1a0] sm:$0xff]  ;;  %v5605_v34 = vld [vmem:[%s8646_s2 + $0x1d8] sm:$0xff] }
 0x145   : > { %7017 = vmatprep.subr.bf16.mxu1 %v7016_v22  ;;  %v7036_v44 = vpack.c.bf16 %v6457_v40, %v2043_v42  ;;  %v5627_v40 = vld [vmem:[%s8646_s2 + $0x208] sm:$0xff]  ;;  %v5629_v42 = vld [vmem:[%s8646_s2 + $0x218] sm:$0xff] }
 0x147   : > { %6396 = vmatmul.mubr.msk.f32.gmra.mrb[18].mxu1 %vm410_vm1, %v5517_v36  ;;  %v6460_v45 = vpop.f32.mrb[44].mxu0  ;;  %v5607_v36 = vld [vmem:[%s8646_s2 + $0x1e8] sm:$0xff] }
 0x148   : > { %7019 = vmatpush3.bf16.msra.mxu1 %v7016_v22  ;;  %6398 = vmatprep.mubr.msk.f32.mxu1 %vm410_vm1, %v5518_v38  ;;  %v2053_v47 = vpop.f32.mrb[45].mxu0  ;;  %v5584_v22 = vld [vmem:[%s8646_s2 + $0x1b0] sm:$0xff]  ;;  %v5609_v38 = vld [vmem:[%s8646_s2 + $0x1f8] sm:$0xff] }
 0x149   : > { %7021 = vmatprep.subr.bf16.mxu1 %v7020_v27  ;;  %v7040_v49 = vpack.c.bf16 %v6460_v45, %v2053_v47  ;;  %v5632_v45 = vld [vmem:[%s8646_s2 + $0x230] sm:$0xff]  ;;  %v1378_v47 = vpop.permute.xlu0 %1377 }
 0x14b   : > { %6399 = vmatmul.mubr.msk.f32.gmra.mrb[20].mxu1 %vm410_vm1, %v5519_v41  ;;  %v6463_v50 = vpop.f32.mrb[46].mxu0  ;;  %v5628_v41 = vld [vmem:[%s8646_s2 + $0x210] sm:$0xff] }
 0x14c   : > { %7023 = vmatpush3.bf16.msra.mxu1 %v7020_v27  ;;  %6401 = vmatprep.mubr.msk.f32.mxu1 %vm410_vm1, %v5520_v43  ;;  %v2063_v52 = vpop.f32.mrb[47].mxu0  ;;  %v5602_v27 = vld [vmem:[%s8646_s2 + $0x1c0] sm:$0xff] }
 0x14d   : > { %7025 = vmatprep.subr.bf16.mxu1 %v7024_v32  ;;  %v7044_v54 = vpack.c.bf16 %v6463_v50, %v2063_v52  ;;  %v5630_v43 = vld [vmem:[%s8646_s2 + $0x220] sm:$0xff]  ;;  %v543_v52 = vpop.permute.xlu1 %542 }
 0x14f   : > { %6402 = vmatmul.mubr.msk.f32.gmra.mrb[22].mxu1 %vm410_vm1, %v5521_v46  ;;  %v6498_v55 = vpop.f32.mrb[48].mxu0  ;;  %v5633_v46 = vld [vmem:[%s8646_s2 + $0x238] sm:$0xff] }
 0x150   : > { %7027 = vmatpush3.bf16.msra.mxu1 %v7024_v32  ;;  %6436 = vmatprep.mubr.msk.f32.mxu1 %vm410_vm1, %v5538_v48  ;;  %v2324_v57 = vpop.f32.mrb[49].mxu0  ;;  %v5604_v32 = vld [vmem:[%s8646_s2 + $0x1d0] sm:$0xff]  ;;  %v1383_v48 = vpop.permute.xlu0 %1382 }
 0x151   : > { %7033 = vmatprep.subr.bf16.mxu1 %v7032_v39  ;;  %v7052_v59 = vpack.c.bf16 %v6498_v55, %v2324_v57 }
 0x153   : > { %6437 = vmatmul.mubr.msk.f32.vlgmr.msra.gmra.mrb[16].mxu1 %vm410_vm1, %v5539_v51  ;;  %v6501_v60 = vpop.f32.mrb[50].mxu0 }
 0x154   : > { %6439 = vmatprep.mubr.msk.f32.mxu1 %vm410_vm1, %v5540_v53  ;;  %7035 = vmatpush3.bf16.msra.mxu1 %v7032_v39  ;;  %v2334_v62 = vpop.f32.mrb[51].mxu0  ;;  %v5626_v39 = vld [vmem:[%s8646_s2 + $0x200] sm:$0xff] }
 0x155   : > { %7037 = vmatprep.subr.bf16.mxu1 %v7036_v44  ;;  %v7056_v0 = vpack.c.bf16 %v6501_v60, %v2334_v62 }
 0x157   : > { %6440 = vmatmul.mubr.msk.f32.gmra.mrb[18].mxu1 %vm410_vm1, %v5541_v56  ;;  %v6504_v1 = vpop.f32.mrb[52].mxu0 }
 0x158   : > { %6442 = vmatprep.mubr.msk.f32.mxu1 %vm410_vm1, %v5542_v58  ;;  %7039 = vmatpush3.bf16.msra.mxu1 %v7036_v44  ;;  %v2344_v4 = vpop.f32.mrb[53].mxu0  ;;  %v5631_v44 = vld [vmem:[%s8646_s2 + $0x228] sm:$0xff] }
 0x159   : > { %7041 = vmatprep.subr.bf16.mxu1 %v7040_v49  ;;  %v7060_v6 = vpack.c.bf16 %v6504_v1, %v2344_v4  ;;  %v1388_v4 = vpop.permute.xlu1 %1387 }
 0x15b   : > { %6443 = vmatmul.mubr.msk.f32.gmra.mrb[20].mxu1 %vm410_vm1, %v5543_v61  ;;  %v6507_v9 = vpop.f32.mrb[54].mxu0 }
 0x15c   : > { %6445 = vmatprep.mubr.msk.f32.mxu1 %vm410_vm1, %v5544_v63  ;;  %7043 = vmatpush3.bf16.msra.mxu1 %v7040_v49  ;;  %v2354_v11 = vpop.f32.mrb[55].mxu0  ;;  %v1393_v49 = vpop.permute.xlu0 %1392 }
 0x15d   : > { %7045 = vmatprep.subr.bf16.mxu1 %v7044_v54  ;;  %v7064_v13 = vpack.c.bf16 %v6507_v9, %v2354_v11 }
 0x15f   : > { %6446 = vmatmul.mubr.msk.f32.gmra.mrb[22].mxu1 %vm410_vm1, %v5545_v2  ;;  %v6542_v14 = vpop.f32.mrb[56].mxu0 }
 0x160   : > { %7047 = vmatpush3.bf16.msra.mxu1 %v7044_v54  ;;  %6480 = vmatprep.mubr.msk.f32.mxu1 %vm410_vm1, %v5578_v5  ;;  %v2575_v16 = vpop.f32.mrb[57].mxu0  ;;  %v1398_v50 = vpop.permute.xlu0 %1397 }
 0x161   : > { %7053 = vmatprep.subr.bf16.mxu1 %v7052_v59  ;;  %v7072_v18 = vpack.c.bf16 %v6542_v14, %v2575_v16  ;;  %v548_v5 = vpop.permute.xlu1 %547 }
 0x163   : > { %6481 = vmatmul.mubr.msk.f32.vlgmr.msra.gmra.mrb[24].mxu1 %vm410_vm1, %v5579_v10  ;;  %v6545_v19 = vpop.f32.mrb[58].mxu0 }
 0x164   : > { %7055 = vmatpush3.bf16.msra.mxu1 %v7052_v59  ;;  %6483 = vmatprep.mubr.msk.f32.mxu1 %vm410_vm1, %v5580_v12  ;;  %v2585_v21 = vpop.f32.mrb[59].mxu0  ;;  %v553_v51 = vpop.permute.xlu0 %552 }
 0x165   : > { %7057 = vmatprep.subr.bf16.mxu1 %v7056_v0  ;;  %v7076_v23 = vpack.c.bf16 %v6545_v19, %v2585_v21 }
 0x167   : > { %6484 = vmatmul.mubr.msk.f32.gmra.mrb[26].mxu1 %vm410_vm1, %v5581_v15  ;;  %v6548_v24 = vpop.f32.mrb[60].mxu0 }
 0x168   : > { %7059 = vmatpush3.bf16.msra.mxu1 %v7056_v0  ;;  %6486 = vmatprep.mubr.msk.f32.mxu1 %vm410_vm1, %v5582_v17  ;;  %v2595_v26 = vpop.f32.mrb[61].mxu0  ;;  %v1413_v55 = vpop.permute.xlu0 %1412 }
 0x169   : > { %7061 = vmatprep.subr.bf16.mxu1 %v7060_v6  ;;  %v7080_v28 = vpack.c.bf16 %v6548_v24, %v2595_v26 }
 0x16b   : > { %6487 = vmatmul.mubr.msk.f32.gmra.mrb[28].mxu1 %vm410_vm1, %v5583_v20  ;;  %v6551_v29 = vpop.f32.mrb[62].mxu0 }
 0x16c   : > { %7063 = vmatpush3.bf16.msra.mxu1 %v7060_v6  ;;  %6489 = vmatprep.mubr.msk.f32.mxu1 %vm410_vm1, %v5584_v22  ;;  %v2605_v31 = vpop.f32.mrb[63].mxu0  ;;  %v563_v60 = vpop.permute.xlu0 %562 }
 0x16d   : > { %7065 = vmatprep.subr.bf16.mxu1 %v7064_v13  ;;  %v7084_v33 = vpack.c.bf16 %v6551_v29, %v2605_v31  ;;  %v1403_v6 = vpop.permute.xlu1 %1402 }
 0x16f   : > { %6490 = vmatmul.mubr.msk.f32.gmra.mrb[30].mxu1 %vm410_vm1, %v5585_v25 }
 0x170   : > { %7067 = vmatpush3.bf16.msra.mxu1 %v7064_v13  ;;  %6524 = vmatprep.mubr.msk.f32.mxu1 %vm410_vm1, %v5602_v27 }
 0x171   : > { %7073 = vmatprep.subr.bf16.mxu1 %v7072_v18  ;;  %v1408_v12 = vpop.permute.xlu1 %1407 }
 0x173   : > { %6525 = vmatmul.mubr.msk.f32.vlgmr.msra.gmra.mrb[24].mxu1 %vm410_vm1, %v5603_v30 }
 0x174   : > { %7075 = vmatpush3.bf16.msra.mxu1 %v7072_v18  ;;  %6527 = vmatprep.mubr.msk.f32.mxu1 %vm410_vm1, %v5604_v32 }
 0x175   : > { %7077 = vmatprep.subr.bf16.mxu1 %v7076_v23  ;;  %v558_v21 = vpop.permute.xlu1 %557 }
 0x177   : > { %6528 = vmatmul.mubr.msk.f32.gmra.mrb[26].mxu1 %vm410_vm1, %v5605_v34 }
 0x178   : > { %7079 = vmatpush3.bf16.msra.mxu1 %v7076_v23  ;;  %6530 = vmatprep.mubr.msk.f32.mxu1 %vm410_vm1, %v5606_v35 }
 0x179   : > { %7081 = vmatprep.subr.bf16.mxu1 %v7080_v28  ;;  %v568_v34 = vpop.permute.xlu1 %567 }
 0x17b   : > { %6531 = vmatmul.mubr.msk.f32.gmra.mrb[28].mxu1 %vm410_vm1, %v5607_v36  ;;  %v573_v36 = vpop.permute.xlu0 %572 }
 0x17c   : > { %7083 = vmatpush3.bf16.msra.mxu1 %v7080_v28  ;;  %6533 = vmatprep.mubr.msk.f32.mxu1 %vm410_vm1, %v5608_v37 }
 0x17d   : > { %7085 = vmatprep.subr.bf16.mxu1 %v7084_v33 }
 0x17f   : > { %6534 = vmatmul.mubr.msk.f32.gmra.mrb[30].mxu1 %vm410_vm1, %v5609_v38 }
 0x180   : > { %7087 = vmatpush3.bf16.msra.mxu1 %v7084_v33  ;;  %6568 = vmatprep.mubr.msk.f32.mxu1 %vm410_vm1, %v5626_v39 }
 0x183   : > { %6569 = vmatmul.mubr.msk.f32.vlgmr.msra.gmra.mrb[24].mxu1 %vm410_vm1, %v5627_v40 }
 0x184   : > { %6571 = vmatprep.mubr.msk.f32.mxu1 %vm410_vm1, %v5628_v41 }
 0x187   : > { %6572 = vmatmul.mubr.msk.f32.gmra.mrb[26].mxu1 %vm410_vm1, %v5629_v42 }
 0x188   : > { %6574 = vmatprep.mubr.msk.f32.mxu1 %vm410_vm1, %v5630_v43  ;;  %v578_v43 = vpop.permute.xlu1 %577 }
 0x18b   : > { %6575 = vmatmul.mubr.msk.f32.gmra.mrb[28].mxu1 %vm410_vm1, %v5631_v44 }
 0x18c   : > { %6577 = vmatprep.mubr.msk.f32.mxu1 %vm410_vm1, %v5632_v45 }
 0x18f   : > { %6578 = vmatmul.mubr.msk.f32.gmra.mrb[30].mxu1 %vm410_vm1, %v5633_v46 }
 0x1f6   : > { %v6306_v53 = vpop.f32.mrb[8].mxu1 }
 0x1f7   : > { %v1043_v54 = vpop.f32.mrb[9].mxu1  ;;  %v7276_v20 = vadd.f32 %v6306_v53, %v548_v5 }
 0x1f8   : > { %v7277_v56 = vadd.f32 %v1043_v54, %v543_v52 }
 0x1f9   : > { %v8141_v28 = vmul.f32 0.25, %v7276_v20  ;;  %v5569_v20 = vld [vmem:[%s8647_s3 + $0xb8] sm:$0xff] }
 0x1fa   : > { %v8114_v57 = vmul.f32 0.25, %v7277_v56  ;;  %v6309_v58 = vpop.f32.mrb[10].mxu1 }
 0x1fb   : > { %v1053_v59 = vpop.f32.mrb[11].mxu1  ;;  %v7278_v37 = vadd.f32 %v6309_v58, %v558_v21  ;;  %v5568_v21 = vld [vmem:[%s8647_s3 + $0xb0] sm:$0xff] }
 0x1fc   : > { %6584 = vmatprep.mubr.msk.f32.mxu0 %vm272_vm0, %v8114_v57  ;;  %v7279_v24 = vadd.f32 %v1053_v59, %v553_v51 }
 0x1fd   : > { %v8165_v41 = vmul.f32 0.25, %v7278_v37 }
 0x1fe   : > { %v6312_v61 = vpop.f32.mrb[12].mxu1  ;;  %v8145_v31 = vmul.f32 0.25, %v7279_v24 }
 0x1ff   : > { %v1063_v62 = vpop.f32.mrb[13].mxu1  ;;  %v7280_v39 = vadd.f32 %v6312_v61, %v568_v34 }
 0x200   : > { %v7281_v63 = vadd.f32 %v1063_v62, %v563_v60 }
 0x201   : > { %v8167_v42 = vmul.f32 0.25, %v7280_v39 }
 0x202   : > { %v8118_v0 = vmul.f32 0.25, %v7281_v63  ;;  %v6315_v1 = vpop.f32.mrb[14].mxu1 }
 0x203   : > { %v1073_v2 = vpop.f32.mrb[15].mxu1  ;;  %v7282_v45 = vadd.f32 %v6315_v1, %v578_v43 }
 0x204   : > { %6598 = vmatprep.mubr.msk.f32.mxu1 %vm272_vm0, %v8118_v0  ;;  %v7283_v40 = vadd.f32 %v1073_v2, %v573_v36 }
 0x205   : > { %v8180_v46 = vmul.f32 0.25, %v7282_v45 }
 0x206   : > { %v8169_v44 = vmul.f32 0.25, %v7283_v40 }
 0x226   : > { %v6438_v9 = vpop.f32.mrb[16].mxu1 }
 0x227   : > { %v7284_v10 = vadd.f32 %v6438_v9, %v1383_v48  ;;  %v1878_v11 = vpop.f32.mrb[17].mxu1 }
 0x228   : > { %v7285_v13 = vadd.f32 %v1878_v11, %v1378_v47 }
 0x22a   : > { %v8128_v15 = vpack.c.bf16 %v7284_v10, %v7285_v13  ;;  %v6441_v16 = vpop.f32.mrb[18].mxu1  ;;  %v5564_v13 = vld [vmem:[%s8647_s3 + $0x90] sm:$0xff] }
 0x22b   : > { %v7286_v17 = vadd.f32 %v6441_v16, %v1393_v49  ;;  %v1888_v18 = vpop.f32.mrb[19].mxu1  ;;  %v5565_v16 = vld [vmem:[%s8647_s3 + $0x98] sm:$0xff] }
 0x22c   : > { %v7287_v19 = vadd.f32 %v1888_v18, %v1388_v4  ;;  %7090 = vmatprep.subr.msk.bf16.mxu0 %vm8124_vm2, %v8128_v15  ;;  %v5567_v18 = vld [vmem:[%s8647_s3 + $0xa8] sm:$0xff] }
 0x22d   : > { %7093 = vmatpush3.bf16.xpose.msk.msra.mxu0 %vm8124_vm2, %v8128_v15 }
 0x22e   : > { %v8136_v22 = vpack.c.bf16 %v7286_v17, %v7287_v19  ;;  %v6444_v23 = vpop.f32.mrb[20].mxu1  ;;  %v5563_v17 = vld [vmem:[%s8647_s3 + $0x88] sm:$0xff]  ;;  %v5566_v19 = vld [vmem:[%s8647_s3 + $0xa0] sm:$0xff] }
 0x22f   : > { %v7288_v25 = vadd.f32 %v6444_v23, %v1403_v6  ;;  %v1898_v26 = vpop.f32.mrb[21].mxu1 }
 0x230   : > { %v7289_v27 = vadd.f32 %v1898_v26, %v1398_v50  ;;  %7096 = vmatprep.subr.msk.bf16.mxu0 %vm8124_vm2, %v8136_v22 }
 0x232   : > { %v8143_v29 = vpack.c.bf16 %v7288_v25, %v7289_v27  ;;  %v6447_v30 = vpop.f32.mrb[22].mxu1 }
 0x233   : > { %v7290_v32 = vadd.f32 %v6447_v30, %v1413_v55  ;;  %v1908_v33 = vpop.f32.mrb[23].mxu1 }
 0x234   : > { %v7291_v35 = vadd.f32 %v1908_v33, %v1408_v12  ;;  %6585 = vmatmul.mubr.msk.f32.vlgmr.msra.gmra.mrb[64].mxu0 %vm272_vm0, %v8141_v28  ;;  %7102 = vmatprep.subr.msk.bf16.mxu1 %vm8124_vm2, %v8143_v29  ;;  %v5562_v12 = vld [vmem:[%s8647_s3 + $0x80] sm:$0xff] }
 0x235   : > { %7099 = vmatpush3.bf16.xpose.msk.msra.mxu0 %vm8124_vm2, %v8136_v22  ;;  %6591 = vmatprep.mubr.msk.f32.mxu0 %vm272_vm0, %v8145_v31 }
 0x236   : > { %v8157_v38 = vpack.c.bf16 %v7290_v32, %v7291_v35  ;;  %7105 = vmatpush3.bf16.xpose.msk.msra.mxu1 %vm8124_vm2, %v8143_v29 }
 0x238   : > { %7108 = vmatprep.subr.msk.bf16.mxu0 %vm8124_vm2, %v8157_v38 }
 0x23c   : > { %6592 = vmatmul.mubr.msk.f32.vlgmr.msra.gmra.mrb[66].mxu0 %vm272_vm0, %v8165_v41 }
 0x23d   : > { %6599 = vmatmul.mubr.msk.f32.vlgmr.msra.gmra.mrb[32].mxu1 %vm272_vm0, %v8167_v42  ;;  %7111 = vmatpush3.bf16.xpose.msk.msra.mxu0 %vm8124_vm2, %v8157_v38 }
 0x23e   : > { %6605 = vmatprep.mubr.msk.f32.mxu0 %vm272_vm0, %v8169_v44 }
 0x244   : > { %6606 = vmatmul.mubr.msk.f32.vlgmr.msra.gmra.mrb[68].mxu0 %vm272_vm0, %v8180_v46 }
 0x256   : > { %v8184_v47 = vpop.f32.mrb[24].mxu1 }
 0x257   : > { %v8186_v48 = vpop.f32.mrb[25].mxu1 }
 0x25a   : > { %v8188_v49 = vpop.f32.mrb[26].mxu1 }
 0x25b   : > { %v8190_v50 = vpop.f32.mrb[27].mxu1 }
 0x25e   : > { %v8192_v51 = vpop.f32.mrb[28].mxu1 }
 0x25f   : > { %v8194_v52 = vpop.f32.mrb[29].mxu1 }
 0x262   : > { %v8196_v53 = vpop.f32.mrb[30].mxu1 }
 0x263   : > { %v8198_v54 = vpop.f32.mrb[31].mxu1 }
 0x307   : > { %v6586_v55 = vpop.f32.mrb[64].mxu0 }
 0x308   : > { %v2846_v56 = vpop.f32.mrb[65].mxu0  ;;  %v3119_v58 = vsel %vm272_vm0, %v6586_v55, -inf }
 0x309   : > { %3120 = vmax.xlane.f32.xlu1 %v3119_v58  ;;  %v3116_v59 = vsel %vm272_vm0, %v2846_v56, -inf }
 0x30a   : > { %3117 = vmax.xlane.f32.xlu0 %v3116_v59 }
 0x30f   : > { %v6593_v60 = vpop.f32.mrb[66].mxu0 }
 0x310   : > { %v6600_v61 = vpop.f32.mrb[32].mxu1  ;;  %v2933_v62 = vpop.f32.mrb[67].mxu0  ;;  %v3125_v63 = vsel %vm272_vm0, %v6593_v60, -inf }
 0x311   : > { %v3020_v1 = vpop.f32.mrb[33].mxu1  ;;  %3126 = vmax.xlane.f32.xlu1 %v3125_v63  ;;  %v3122_v2 = vsel %vm272_vm0, %v2933_v62, -inf  ;;  %v3131_v9 = vsel %vm272_vm0, %v6600_v61, -inf }
 0x312   : > { %3123 = vmax.xlane.f32.xlu0 %v3122_v2  ;;  %v3128_v4 = vsel %vm272_vm0, %v3020_v1, -inf }
 0x316   : > { %3129 = vmax.xlane.f32.xlu0 %v3128_v4 }
 0x317   : > { %v6607_v5 = vpop.f32.mrb[68].mxu0 }
 0x318   : > { %v3107_v6 = vpop.f32.mrb[69].mxu0  ;;  %v3137_v11 = vsel %vm272_vm0, %v6607_v5, -inf }
 0x319   : > { %v3134_v10 = vsel %vm272_vm0, %v3107_v6, -inf }
 0x31a   : > { %3132 = vmax.xlane.f32.xlu0 %v3131_v9  ;;  %3135 = vmax.xlane.f32.xlu1 %v3134_v10 }
 0x31e   : > { %3138 = vmax.xlane.f32.xlu0 %v3137_v11 }
 0x32b   : > { %2212 = vperm.xlu1 %7417, %v5562_v12  }
 0x32f   : > { %2222 = vperm.xlu1 %7417, %v5564_v13  }
 0x333   : > { %2227 = vperm.xlu1 %7417, %v5565_v16  }
 0x334   : > { %2217 = vperm.xlu0 %7416, %v5563_v17  }
 0x337   : > { %2237 = vperm.xlu1 %7417, %v5567_v18  }
 0x338   : > { %2232 = vperm.xlu0 %7416, %v5566_v19  }
 0x33b   : > { %2247 = vperm.xlu1 %7417, %v5569_v20  }
 0x33c   : > { %2242 = vperm.xlu0 %7416, %v5568_v21  }
 0x396   : > { %v3121_v23 = vpop.xlane.xlu1 %3120 }
 0x397   : > { %v3141_v24 = vsub.f32 %v6586_v55, %v3121_v23  ;;  %v3118_v25 = vpop.xlane.xlu0 %3117 }
 0x398   : > { %v3140_v26 = vsub.f32 %v2846_v56, %v3118_v25 }
 0x399   : > { %v3150_v27 = vmul.f32 1.442695, %v3141_v24 }
 0x39a   : > { %v3148_v30 = vmul.f32 1.442695, %v3140_v26 }
 0x39b   : > { %7418 = vpow2.f32 %v3150_v27 }
 0x39c   : > { %7420 = vpow2.f32 %v3148_v30 }
 0x39e   : > { %v3127_v32 = vpop.xlane.xlu1 %3126 }
 0x39f   : > { %v3143_v33 = vsub.f32 %v6593_v60, %v3127_v32  ;;  %v3124_v34 = vpop.xlane.xlu0 %3123 }
 0x3a0   : > { %v3142_v35 = vsub.f32 %v2933_v62, %v3124_v34 }
 0x3a1   : > { %v3154_v36 = vmul.f32 1.442695, %v3143_v33 }
 0x3a2   : > { %v3152_v37 = vmul.f32 1.442695, %v3142_v35 }
 0x3a3   : > { %7422 = vpow2.f32 %v3154_v36  ;;  %v3130_v39 = vpop.xlane.xlu0 %3129 }
 0x3a4   : > { %7424 = vpow2.f32 %v3152_v37  ;;  %v3144_v45 = vsub.f32 %v3020_v1, %v3130_v39 }
 0x3a5   : > { %v8232_v40 = vpop.eup %7418 }
 0x3a6   : > { %v8234_v43 = vpop.eup %7420  ;;  %v3167_v55 = vsel %vm272_vm0, %v8232_v40, 0.0  ;;  %v3156_v63 = vmul.f32 1.442695, %v3144_v45 }
 0x3a7   : > { %v3133_v56 = vpop.xlane.xlu0 %3132  ;;  %3168 = vadd.xlane.f32.xlu0 %v3167_v55  ;;  %v3136_v58 = vpop.xlane.xlu1 %3135  ;;  %v3164_v59 = vsel %vm272_vm0, %v8234_v43, 0.0 }
 0x3a8   : > { %v3145_v60 = vsub.f32 %v6600_v61, %v3133_v56  ;;  %v3146_v62 = vsub.f32 %v3107_v6, %v3136_v58  ;;  %3165 = vadd.xlane.f32.xlu1 %v3164_v59 }
 0x3aa   : > { %v3158_v2 = vmul.f32 1.442695, %v3145_v60  ;;  %v3160_v4 = vmul.f32 1.442695, %v3146_v62 }
 0x3ab   : > { %v3139_v9 = vpop.xlane.xlu0 %3138  ;;  %v2213_v10 = vpop.permute.xlu1 %2212 }
 0x3ac   : > { %7426 = vpow2.f32 %v3158_v2  ;;  %v3147_v11 = vsub.f32 %v6607_v5, %v3139_v9  ;;  %v8249_v5 = vadd.f32 %v8186_v48, %v2213_v10 }
 0x3ad   : > { %v8240_v1 = vpop.eup %7422  ;;  %7428 = vpow2.f32 %v3160_v4 }
 0x3ae   : > { %7430 = vpow2.f32 %v3156_v63  ;;  %v3162_v12 = vmul.f32 1.442695, %v3147_v11  ;;  %v3173_v13 = vsel %vm272_vm0, %v8240_v1, 0.0  ;;  %v8244_v16 = vpop.eup %7424 }
 0x3af   : > { %3174 = vadd.xlane.f32.xlu1 %v3173_v13  ;;  %v2223_v61 = vpop.permute.xlu1 %2222  ;;  %v3170_v6 = vsel %vm272_vm0, %v8244_v16, 0.0 }
 0x3b0   : > { %7432 = vpow2.f32 %v3162_v12  ;;  %v8252_v19 = vadd.f32 %v8190_v50, %v2223_v61 }
 0x3b3   : > { %v2218_v17 = vpop.permute.xlu0 %2217  ;;  %3171 = vadd.xlane.f32.xlu1 %v3170_v6  ;;  %v2228_v18 = vpop.permute.xlu1 %2227 }
 0x3b4   : > { %v8255_v20 = vadd.f32 %v8184_v47, %v2218_v17  ;;  %v8258_v21 = vadd.f32 %v8188_v49, %v2228_v18 }
 0x3b6   : > { %v8260_v23 = vpop.eup %7426  ;;  %v7112_v24 = vpack.c.bf16 %v8255_v20, %v8249_v5  ;;  %v7116_v25 = vpack.c.bf16 %v8258_v21, %v8252_v19 }
 0x3b7   : > { %v8266_v26 = vpop.eup %7428  ;;  %v2233_v48 = vpop.permute.xlu0 %2232  ;;  %v3179_v50 = vsel %vm272_vm0, %v8260_v23, 0.0 }
 0x3b8   : > { %v2238_v27 = vpop.permute.xlu1 %2237  ;;  %v8270_v47 = vpop.eup %7430  ;;  %v8273_v49 = vadd.f32 %v8194_v52, %v2233_v48  ;;  %3180 = vadd.xlane.f32.xlu0 %v3179_v50  ;;  %v3182_v32 = vsel %vm272_vm0, %v8266_v26, 0.0  ;;  %7113 = vmatprep.subr.bf16.mxu1 %v7112_v24 }
 0x3b9   : > { %v8276_v30 = vadd.f32 %v8192_v51, %v2238_v27  ;;  %3183 = vadd.xlane.f32.xlu1 %v3182_v32  ;;  %7117 = vmatprep.subr.bf16.mxu0 %v7116_v25  ;;  %v3176_v52 = vsel %vm272_vm0, %v8270_v47, 0.0 }
 0x3ba   : > { %7115 = vmatpush3.bf16.msra.mxu1 %v7112_v24  ;;  %7119 = vmatpush3.bf16.msra.mxu0 %v7116_v25  ;;  %v7433_v36 = vpop.eup %7432 }
 0x3bb   : > { %v7120_v33 = vpack.c.bf16 %v8276_v30, %v8273_v49  ;;  %v2243_v34 = vpop.permute.xlu0 %2242  ;;  %v3185_v45 = vsel %vm272_vm0, %v7433_v36, 0.0 }
 0x3bc   : > { %v2248_v35 = vpop.permute.xlu1 %2247  ;;  %v8285_v51 = vadd.f32 %v8198_v54, %v2243_v34  ;;  %3177 = vadd.xlane.f32.xlu0 %v3176_v52 }
 0x3bd   : > { %v8288_v37 = vadd.f32 %v8196_v53, %v2248_v35  ;;  %7121 = vmatprep.subr.bf16.mxu1 %v7120_v33 }
 0x3bf   : > { %v7124_v39 = vpack.c.bf16 %v8288_v37, %v8285_v51 }
 0x3c0   : > { %3186 = vadd.xlane.f32.xlu0 %v3185_v45 }
 0x3c1   : > { %7125 = vmatprep.subr.bf16.mxu0 %v7124_v39 }
 0x3ec   : > { %3641 = vxpose.xlu1.b32.start [1/2] (short) (narrow) %v8145_v31, 16 }
 0x3ed   : > { %3528 = vxpose.xlu0.b32.start [1/2] (short) (narrow) %v8114_v57, 16 }
 0x3f0   : > { %3642 = vxpose.xlu1.b32.end [2/2] (short) (narrow) %v8165_v41, 16 }
 0x3f1   : > { %3529 = vxpose.xlu0.b32.end [2/2] (short) (narrow) %v8141_v28, 16 }
 0x3f5   : > { %3754 = vxpose.xlu0.b32.start [1/2] (short) (narrow) %v8118_v0, 16 }
 0x3f9   : > { %3755 = vxpose.xlu0.b32.end [2/2] (short) (narrow) %v8167_v42, 16 }
 0x3fd   : > { %3867 = vxpose.xlu0.b32.start [1/2] (short) (narrow) %v8169_v44, 16 }
 0x401   : > { %3868 = vxpose.xlu0.b32.end [2/2] (short) (narrow) %v8180_v46, 16 }
 0x434   : > { %v3169_v53 = vpop.xlane.xlu0 %3168 }
 0x435   : > { %7434 = vrcp.f32 %v3169_v53  ;;  %v3166_v54 = vpop.xlane.xlu1 %3165 }
 0x436   : > { %7436 = vrcp.f32 %v3166_v54 }
 0x43c   : > { %v3175_v55 = vpop.xlane.xlu1 %3174 }
 0x43d   : > { %7438 = vrcp.f32 %v3175_v55 }
 0x43f   : > { %v7435_v31 = vpop.eup %7434 }
 0x440   : > { %v7437_v56 = vpop.eup %7436  ;;  %v3172_v57 = vpop.xlane.xlu1 %3171  ;;  %v3197_v0 = vmul.f32 %v7435_v31, %v8232_v40 }
 0x441   : > { %7440 = vrcp.f32 %v3172_v57  ;;  %v3196_v28 = vmul.f32 %v7437_v56, %v8234_v43 }
 0x443   : > { %6612 = vmatprep.mubr.msk.f32.mxu1 %vm272_vm0, %v3196_v28 }
 0x444   : > { %6613 = vmatmul.mubr.msk.f32.vlgmr.msra.gmra.mrb[34].mxu1 %vm272_vm0, %v3197_v0 }
 0x445   : > { %7123 = vmatpush3.bf16.msra.mxu1 %v7120_v33  ;;  %v3181_v41 = vpop.xlane.xlu0 %3180 }
 0x446   : > { %7129 = vmatprep.subr.bf16.mxu1 %v8128_v15  ;;  %v3184_v42 = vpop.xlane.xlu1 %3183 }
 0x447   : > { %7442 = vrcp.f32 %v3184_v42  ;;  %v7439_v46 = vpop.eup %7438 }
 0x448   : > { %7444 = vrcp.f32 %v3181_v41  ;;  %v3199_v43 = vmul.f32 %v7439_v46, %v8240_v1 }
 0x449   : > { %v3178_v44 = vpop.xlane.xlu0 %3177 }
 0x44a   : > { %7446 = vrcp.f32 %v3178_v44 }
 0x44b   : > { %v7441_v58 = vpop.eup %7440 }
 0x44c   : > { %v3198_v59 = vmul.f32 %v7441_v58, %v8244_v16 }
 0x44d   : > { %v3187_v40 = vpop.xlane.xlu0 %3186 }
 0x44e   : > { %7448 = vrcp.f32 %v3187_v40  ;;  %6619 = vmatprep.mubr.msk.f32.mxu0 %vm272_vm0, %v3198_v59 }
 0x44f   : > { %6620 = vmatmul.mubr.msk.f32.vlgmr.msra.gmra.mrb[70].mxu0 %vm272_vm0, %v3199_v43 }
 0x450   : > { %7127 = vmatpush3.bf16.msra.mxu0 %v7124_v39 }
 0x451   : > { %v7443_v60 = vpop.eup %7442  ;;  %7133 = vmatprep.subr.bf16.mxu0 %v8136_v22 }
 0x452   : > { %v3202_v62 = vmul.f32 %v7443_v60, %v8266_v26  ;;  %v7445_v63 = vpop.eup %7444 }
 0x453   : > { %v3201_v9 = vmul.f32 %v7445_v63, %v8260_v23 }
 0x454   : > { %v7447_v2 = vpop.eup %7446  ;;  %6633 = vmatprep.mubr.msk.f32.mxu0 %vm272_vm0, %v3202_v62 }
 0x455   : > { %v3200_v4 = vmul.f32 %v7447_v2, %v8270_v47 }
 0x457   : > { %6626 = vmatprep.mubr.msk.f32.mxu1 %vm272_vm0, %v3200_v4 }
 0x458   : > { %v7449_v10 = vpop.eup %7448  ;;  %6627 = vmatmul.mubr.msk.f32.vlgmr.msra.gmra.mrb[36].mxu1 %vm272_vm0, %v3201_v9 }
 0x459   : > { %v3203_v11 = vmul.f32 %v7449_v10, %v7433_v36  ;;  %7131 = vmatpush3.bf16.msra.mxu1 %v8128_v15 }
 0x45a   : > { %7137 = vmatprep.subr.bf16.mxu1 %v8143_v29 }
 0x45b   : > { %6634 = vmatmul.mubr.msk.f32.vlgmr.msra.gmra.mrb[72].mxu0 %vm272_vm0, %v3203_v11 }
 0x45c   : > { %7135 = vmatpush3.bf16.msra.mxu0 %v8136_v22 }
 0x45d   : > { %7141 = vmatprep.subr.bf16.mxu0 %v8157_v38 }
 0x46c   : > { %v3657_v1 = vpop.trf.xlu1 }
 0x46d   : > { %v3544_v12 = vpop.trf.xlu0  ;;  %6647 = vmatprep.mubr.msk.f32.mxu0 %vm272_vm0, %v3657_v1 }
 0x46e   : > { %6640 = vmatprep.mubr.msk.f32.mxu1 %vm272_vm0, %v3544_v12 }
 0x470   : > { %v3658_v13 = vpop.trf.xlu1 }
 0x471   : > { %6648 = vmatmul.mubr.msk.f32.vlgmr.msra.gmra.mrb[74].mxu0 %vm272_vm0, %v3658_v13  ;;  %v3545_v16 = vpop.trf.xlu0 }
 0x472   : > { %7143 = vmatpush3.bf16.msra.mxu0 %v8157_v38  ;;  %6641 = vmatmul.mubr.msk.f32.vlgmr.msra.gmra.mrb[38].mxu1 %vm272_vm0, %v3545_v16 }
 0x473   : > { %7139 = vmatpush3.bf16.msra.mxu1 %v8143_v29 }
 0x475   : > { %v3770_v15 = vpop.trf.xlu0 }
 0x476   : > { %6654 = vmatprep.mubr.msk.f32.mxu1 %vm272_vm0, %v3770_v15 }
 0x479   : > { %v3771_v22 = vpop.trf.xlu0 }
 0x47a   : > { %6655 = vmatmul.mubr.msk.f32.vlgmr.msra.gmra.mrb[40].mxu1 %vm272_vm0, %v3771_v22 }
 0x47b   : > { %6668 = vmatprep.mubr.msk.f32.mxu1 %vm272_vm0, %v8249_v5 }
 0x47d   : > { %v3883_v61 = vpop.trf.xlu0 }
 0x47e   : > { %6661 = vmatprep.mubr.msk.f32.mxu0 %vm272_vm0, %v3883_v61 }
 0x481   : > { %v3884_v6 = vpop.trf.xlu0 }
 0x482   : > { %6662 = vmatmul.mubr.msk.f32.vlgmr.msra.gmra.mrb[76].mxu0 %vm272_vm0, %v3884_v6 }
 0x483   : > { %6675 = vmatprep.mubr.msk.f32.mxu0 %vm272_vm0, %v8252_v19 }
 0x517   : > { %v8336_v38 = vpop.f32.mrb[34].mxu1 }
 0x518   : > { %v8338_v29 = vpop.f32.mrb[35].mxu1 }
 0x522   : > { %v8340_v17 = vpop.f32.mrb[70].mxu0 }
 0x523   : > { %v8342_v18 = vpop.f32.mrb[71].mxu0 }
 0x52b   : > { %v8344_v23 = vpop.f32.mrb[36].mxu1 }
 0x52c   : > { %v8346_v5 = vpop.f32.mrb[37].mxu1 }
 0x52e   : > { %v8348_v24 = vpop.f32.mrb[72].mxu0 }
 0x52f   : > { %v8350_v25 = vpop.f32.mrb[73].mxu0 }
 0x544   : > { %v6649_v26 = vpop.f32.mrb[74].mxu0 }
 0x545   : > { %v6642_v48 = vpop.f32.mrb[38].mxu1  ;;  %v3745_v27 = vpop.f32.mrb[75].mxu0  ;;  %v3989_v32 = vsel %vm272_vm0, %v6649_v26, -inf }
 0x546   : > { %v3632_v19 = vpop.f32.mrb[39].mxu1  ;;  %v3983_v50 = vsel %vm272_vm0, %v6642_v48, -inf  ;;  %v3986_v52 = vsel %vm272_vm0, %v3745_v27, -inf }
 0x547   : > { %3984 = vmax.xlane.f32.xlu0 %v3983_v50  ;;  %v3980_v47 = vsel %vm272_vm0, %v3632_v19, -inf }
 0x548   : > { %3981 = vmax.xlane.f32.xlu1 %v3980_v47 }
 0x54c   : > { %3990 = vmax.xlane.f32.xlu1 %v3989_v32 }
 0x54d   : > { %v6656_v33 = vpop.f32.mrb[40].mxu1 }
 0x54e   : > { %v3995_v34 = vsel %vm272_vm0, %v6656_v33, -inf  ;;  %v3858_v35 = vpop.f32.mrb[41].mxu1 }
 0x54f   : > { %3996 = vmax.xlane.f32.xlu0 %v3995_v34  ;;  %v3992_v36 = vsel %vm272_vm0, %v3858_v35, -inf }
 0x550   : > { %3987 = vmax.xlane.f32.xlu1 %v3986_v52  ;;  %v4416_v52 = vld [vmem:[%s8649_s5] sm:$0xff] }
 0x554   : > { %3993 = vmax.xlane.f32.xlu1 %v3992_v36  ;;  %v4417_v36 = vld [vmem:[%s8649_s5 + $0x8] sm:$0xff] }
 0x555   : > { %v6663_v39 = vpop.f32.mrb[76].mxu0 }
 0x556   : > { %v3971_v45 = vpop.f32.mrb[77].mxu0  ;;  %v4001_v53 = vsel %vm272_vm0, %v6663_v39, -inf }
 0x557   : > { %4002 = vmax.xlane.f32.xlu0 %v4001_v53  ;;  %v3998_v54 = vsel %vm272_vm0, %v3971_v45, -inf  ;;  %v4419_v53 = vld [vmem:[%s8649_s5 + $0x18] sm:$0xff] }
 0x558   : > { %3999 = vmax.xlane.f32.xlu1 %v3998_v54  ;;  %v4422_v54 = vld [vmem:[%s8649_s5 + $0x30] sm:$0xff] }
 0x5d4   : > { %v3985_v55 = vpop.xlane.xlu0 %3984 }
 0x5d5   : > { %v4005_v31 = vsub.f32 %v6642_v48, %v3985_v55  ;;  %v3982_v56 = vpop.xlane.xlu1 %3981  ;;  %v4421_v55 = vld [vmem:[%s8649_s5 + $0x28] sm:$0xff] }
 0x5d6   : > { %v4004_v57 = vsub.f32 %v3632_v19, %v3982_v56 }
 0x5d7   : > { %v4014_v28 = vmul.f32 1.442695, %v4005_v31  ;;  %v4423_v31 = vld [vmem:[%s8649_s5 + $0x38] sm:$0xff] }
 0x5d8   : > { %v4012_v0 = vmul.f32 1.442695, %v4004_v57 }
 0x5d9   : > { %7450 = vpow2.f32 %v4014_v28  ;;  %v3991_v41 = vpop.xlane.xlu1 %3990 }
 0x5da   : > { %7452 = vpow2.f32 %v4012_v0  ;;  %v4007_v42 = vsub.f32 %v6649_v26, %v3991_v41 }
 0x5dc   : > { %v4018_v44 = vmul.f32 1.442695, %v4007_v42  ;;  %v3997_v46 = vpop.xlane.xlu0 %3996 }
 0x5dd   : > { %v4009_v58 = vsub.f32 %v6656_v33, %v3997_v46  ;;  %v3988_v59 = vpop.xlane.xlu1 %3987 }
 0x5de   : > { %7454 = vpow2.f32 %v4018_v44  ;;  %v4006_v43 = vsub.f32 %v3745_v27, %v3988_v59 }
 0x5df   : > { %v4022_v40 = vmul.f32 1.442695, %v4009_v58 }
 0x5e0   : > { %v4016_v60 = vmul.f32 1.442695, %v4006_v43 }
 0x5e1   : > { %7456 = vpow2.f32 %v4022_v40  ;;  %v3994_v62 = vpop.xlane.xlu1 %3993 }
 0x5e2   : > { %7458 = vpow2.f32 %v4016_v60  ;;  %v4008_v63 = vsub.f32 %v3858_v35, %v3994_v62 }
 0x5e3   : > { %v7451_v2 = vpop.eup %7450 }
 0x5e4   : > { %v8360_v4 = vpop.eup %7452  ;;  %v4020_v9 = vmul.f32 1.442695, %v4008_v63  ;;  %v4003_v10 = vpop.xlane.xlu0 %4002  ;;  %v4031_v11 = vsel %vm272_vm0, %v7451_v2, 0.0 }
 0x5e5   : > { %v4011_v1 = vsub.f32 %v6663_v39, %v4003_v10  ;;  %4032 = vadd.xlane.f32.xlu0 %v4031_v11  ;;  %v4000_v12 = vpop.xlane.xlu1 %3999  ;;  %v4028_v13 = vsel %vm272_vm0, %v8360_v4, 0.0  ;;  %v4418_v39 = vld [vmem:[%s8649_s5 + $0x10] sm:$0xff] }
 0x5e6   : > { %7460 = vpow2.f32 %v4020_v9  ;;  %v4010_v16 = vsub.f32 %v3971_v45, %v4000_v12  ;;  %4029 = vadd.xlane.f32.xlu1 %v4028_v13  ;;  %v4420_v45 = vld [vmem:[%s8649_s5 + $0x20] sm:$0xff] }
 0x5e7   : > { %v4026_v15 = vmul.f32 1.442695, %v4011_v1 }
 0x5e8   : > { %v8365_v22 = vpop.eup %7454  ;;  %v4024_v61 = vmul.f32 1.442695, %v4010_v16 }
 0x5e9   : > { %7462 = vpow2.f32 %v4026_v15  ;;  %v4037_v6 = vsel %vm272_vm0, %v8365_v22, 0.0 }
 0x5ea   : > { %7464 = vpow2.f32 %v4024_v61  ;;  %4038 = vadd.xlane.f32.xlu0 %v4037_v6 }
 0x5eb   : > { %v8369_v26 = vpop.eup %7456 }
 0x5ec   : > { %v7459_v48 = vpop.eup %7458  ;;  %v4043_v27 = vsel %vm272_vm0, %v8369_v26, 0.0 }
 0x5ed   : > { %v4034_v19 = vsel %vm272_vm0, %v7459_v48, 0.0 }
 0x5ee   : > { %4044 = vadd.xlane.f32.xlu0 %v4043_v27  ;;  %4035 = vadd.xlane.f32.xlu1 %v4034_v19 }
 0x5f0   : > { %v7461_v50 = vpop.eup %7460 }
 0x5f1   : > { %v4040_v47 = vsel %vm272_vm0, %v7461_v50, 0.0 }
 0x5f2   : > { %4041 = vadd.xlane.f32.xlu1 %v4040_v47 }
 0x5f3   : > { %v7463_v32 = vpop.eup %7462 }
 0x5f4   : > { %v7465_v33 = vpop.eup %7464  ;;  %v4049_v34 = vsel %vm272_vm0, %v7463_v32, 0.0 }
 0x5f5   : > { %4050 = vadd.xlane.f32.xlu0 %v4049_v34  ;;  %v4046_v35 = vsel %vm272_vm0, %v7465_v33, 0.0 }
 0x5f6   : > { %4047 = vadd.xlane.f32.xlu1 %v4046_v35 }
 0x607   : > { %4732 = vperm.xlu1 %7417, %v4416_v52  }
 0x60b   : > { %4737 = vperm.xlu0 %7416, %v4417_v36   ;;  %4742 = vperm.xlu1 %7417, %v4418_v39  }
 0x60f   : > { %4752 = vperm.xlu0 %7416, %v4420_v45   ;;  %4747 = vperm.xlu1 %7417, %v4419_v53  }
 0x613   : > { %4762 = vperm.xlu0 %7416, %v4422_v54   ;;  %4757 = vperm.xlu1 %7417, %v4421_v55  }
 0x617   : > { %4767 = vperm.xlu1 %7417, %v4423_v31   ;;  %v4618_v31 = vld [vmem:[%s8648_s4 + $0x8] sm:$0xff] }
 0x672   : > { %v4033_v56 = vpop.xlane.xlu0 %4032 }
 0x673   : > { %7466 = vrcp.f32 %v4033_v56  ;;  %v4030_v57 = vpop.xlane.xlu1 %4029 }
 0x674   : > { %7468 = vrcp.f32 %v4030_v57  ;;  %v4619_v57 = vld [vmem:[%s8648_s4 + $0x10] sm:$0xff] }
 0x677   : > { %v4039_v28 = vpop.xlane.xlu0 %4038 }
 0x678   : > { %7470 = vrcp.f32 %v4039_v28 }
 0x67b   : > { %v4045_v0 = vpop.xlane.xlu0 %4044  ;;  %v4036_v41 = vpop.xlane.xlu1 %4035 }
 0x67c   : > { %7472 = vrcp.f32 %v4036_v41  ;;  %v4620_v41 = vld [vmem:[%s8648_s4 + $0x18] sm:$0xff] }
 0x67d   : > { %v7467_v42 = vpop.eup %7466  ;;  %7474 = vrcp.f32 %v4045_v0 }
 0x67e   : > { %v7469_v44 = vpop.eup %7468  ;;  %v4061_v46 = vmul.f32 %v7467_v42, %v7451_v2 }
 0x67f   : > { %v4042_v58 = vpop.xlane.xlu1 %4041  ;;  %v4060_v59 = vmul.f32 %v7469_v44, %v8360_v4  ;;  %v4621_v44 = vld [vmem:[%s8648_s4 + $0x20] sm:$0xff] }
 0x680   : > { %7476 = vrcp.f32 %v4042_v58 }
 0x681   : > { %v7144_v43 = vpack.c.bf16 %v4061_v46, %v4060_v59  ;;  %v4622_v59 = vld [vmem:[%s8648_s4 + $0x28] sm:$0xff] }
 0x682   : > { %v4051_v40 = vpop.xlane.xlu0 %4050  ;;  %v7471_v62 = vpop.eup %7470 }
 0x683   : > { %7478 = vrcp.f32 %v4051_v40  ;;  %7146 = vmatprep.subr.msk.bf16.mxu1 %vm8124_vm2, %v7144_v43  ;;  %v4048_v60 = vpop.xlane.xlu1 %4047  ;;  %v4063_v2 = vmul.f32 %v7471_v62, %v8365_v22  ;;  %v4623_v40 = vld [vmem:[%s8648_s4 + $0x30] sm:$0xff] }
 0x684   : > { %7480 = vrcp.f32 %v4048_v60  ;;  %7149 = vmatpush3.bf16.xpose.msk.msra.mxu1 %vm8124_vm2, %v7144_v43 }
 0x686   : > { %v7473_v63 = vpop.eup %7472 }
 0x687   : > { %v7475_v9 = vpop.eup %7474  ;;  %v4062_v10 = vmul.f32 %v7473_v63, %v7459_v48  ;;  %v4624_v63 = vld [vmem:[%s8648_s4 + $0x38] sm:$0xff] }
 0x688   : > { %v4065_v12 = vmul.f32 %v7475_v9, %v8369_v26 }
 0x689   : > { %v7150_v4 = vpack.c.bf16 %v4063_v2, %v4062_v10  ;;  %v5722_v10 = vld [vmem:[%s8648_s4 + $0x40] sm:$0xff] }
 0x68a   : > { %v7477_v11 = vpop.eup %7476 }
 0x68b   : > { %6669 = vmatmul.mubr.msk.f32.vlgmr.msra.gmra.mrb[42].mxu1 %vm272_vm0, %v8255_v20  ;;  %v4064_v1 = vmul.f32 %v7477_v11, %v7461_v50  ;;  %7152 = vmatprep.subr.msk.bf16.mxu0 %vm8124_vm2, %v7150_v4 }
 0x68c   : > { %6682 = vmatprep.mubr.msk.f32.mxu1 %vm272_vm0, %v8273_v49  ;;  %7155 = vmatpush3.bf16.xpose.msk.msra.mxu0 %vm8124_vm2, %v7150_v4 }
 0x68d   : > { %v7479_v13 = vpop.eup %7478  ;;  %v7156_v16 = vpack.c.bf16 %v4065_v12, %v4064_v1 }
 0x68e   : > { %v7481_v15 = vpop.eup %7480  ;;  %v4067_v22 = vmul.f32 %v7479_v13, %v7463_v32 }
 0x68f   : > { %7158 = vmatprep.subr.msk.bf16.mxu1 %vm8124_vm2, %v7156_v16  ;;  %v4066_v20 = vmul.f32 %v7481_v15, %v7465_v33 }
 0x690   : > { %7161 = vmatpush3.bf16.xpose.msk.msra.mxu1 %vm8124_vm2, %v7156_v16 }
 0x691   : > { %v7162_v61 = vpack.c.bf16 %v4067_v22, %v4066_v20  ;;  %7169 = vmatprep.subr.bf16.mxu1 %v7643_v3 }
 0x693   : > { %7164 = vmatprep.subr.msk.bf16.mxu0 %vm8124_vm2, %v7162_v61  ;;  %6676 = vmatmul.mubr.msk.f32.vlgmr.msra.gmra.mrb[78].mxu0 %vm272_vm0, %v8258_v21 }
 0x694   : > { %7167 = vmatpush3.bf16.xpose.msk.msra.mxu0 %vm8124_vm2, %v7162_v61  ;;  %6689 = vmatprep.mubr.msk.f32.mxu0 %vm272_vm0, %v8285_v51 }
 0x697   : > { %6683 = vmatmul.mubr.msk.f32.vlgmr.msra.gmra.mrb[44].mxu1 %vm272_vm0, %v8276_v30 }
 0x698   : > { %7171 = vmatpush3.bf16.msra.mxu1 %v7643_v3 }
 0x699   : > { %7205 = vmatprep.subr.bf16.mxu1 %v7655_v7 }
 0x69b   : > { %6690 = vmatmul.mubr.msk.f32.vlgmr.msra.gmra.mrb[80].mxu0 %vm272_vm0, %v8288_v37 }
 0x75e   : > { %v6670_v49 = vpop.f32.mrb[42].mxu1 }
 0x75f   : > { %v4146_v6 = vpop.f32.mrb[43].mxu1 }
 0x760   : > { %6696 = vmatprep.mubr.msk.f32.mxu1 %vm272_vm0, %v4146_v6 }
 0x761   : > { %6697 = vmatmul.mubr.msk.f32.vlgmr.msra.gmra.mrb[46].mxu1 %vm272_vm0, %v6670_v49 }
 0x762   : > { %7207 = vmatpush3.bf16.msra.mxu1 %v7655_v7  ;;  %v4617_v7 = vld [vmem:[%s8648_s4] sm:$0xff] }
 0x763   : > { %7241 = vmatprep.subr.bf16.mxu1 %v7657_v8  ;;  %6752 = vmatprep.mubr.f32.mxu0 %v4617_v7  ;;  %v5725_v7 = vld [vmem:[%s8648_s4 + $0x58] sm:$0xff] }
 0x766   : > { %v6677_v14 = vpop.f32.mrb[78].mxu0 }
 0x767   : > { %v4233_v21 = vpop.f32.mrb[79].mxu0 }
 0x768   : > { %6699 = vmatprep.mubr.msk.f32.mxu1 %vm272_vm0, %v4233_v21 }
 0x769   : > { %6700 = vmatmul.mubr.msk.f32.gmra.mrb[48].mxu1 %vm272_vm0, %v6677_v14 }
 0x76a   : > { %v6684_v3 = vpop.f32.mrb[44].mxu1 }
 0x76b   : > { %v4320_v30 = vpop.f32.mrb[45].mxu1 }
 0x76c   : > { %6702 = vmatprep.mubr.msk.f32.mxu1 %vm272_vm0, %v4320_v30 }
 0x76d   : > { %6703 = vmatmul.mubr.msk.f32.gmra.mrb[50].mxu1 %vm272_vm0, %v6684_v3 }
 0x76e   : > { %v6691_v51 = vpop.f32.mrb[80].mxu0 }
 0x76f   : > { %v4407_v37 = vpop.f32.mrb[81].mxu0 }
 0x770   : > { %6705 = vmatprep.mubr.msk.f32.mxu1 %vm272_vm0, %v4407_v37 }
 0x771   : > { %6706 = vmatmul.mubr.msk.f32.gmra.mrb[52].mxu1 %vm272_vm0, %v6691_v51 }
 0x772   : > { %6708 = vmatprep.mubr.msk.f32.mxu1 %vm272_vm0, %v8338_v29 }
 0x775   : > { %6709 = vmatmul.mubr.msk.f32.gmra.mrb[54].mxu1 %vm272_vm0, %v8336_v38 }
 0x776   : > { %6711 = vmatprep.mubr.msk.f32.mxu1 %vm272_vm0, %v8342_v18 }
 0x779   : > { %6712 = vmatmul.mubr.msk.f32.gmra.mrb[56].mxu1 %vm272_vm0, %v8340_v17 }
 0x77a   : > { %6714 = vmatprep.mubr.msk.f32.mxu1 %vm272_vm0, %v8346_v5 }
 0x77d   : > { %6715 = vmatmul.mubr.msk.f32.gmra.mrb[58].mxu1 %vm272_vm0, %v8344_v23 }
 0x77e   : > { %6717 = vmatprep.mubr.msk.f32.mxu1 %vm272_vm0, %v8350_v25 }
 0x781   : > { %6718 = vmatmul.mubr.msk.f32.gmra.mrb[60].mxu1 %vm272_vm0, %v8348_v24 }
 0x782   : > { %6768 = vmatprep.mubr.msk.f32.mxu1 %vm272_vm0, %v4146_v6 }
 0x785   : > { %6769 = vmatmul.mubr.msk.f32.vlgmr.msra.gmra.mrb[62].mxu1 %vm272_vm0, %v6670_v49 }
 0x786   : > { %6771 = vmatprep.mubr.msk.f32.mxu1 %vm272_vm0, %v4233_v21  ;;  %7243 = vmatpush3.bf16.msra.mxu1 %v7657_v8 }
 0x789   : > { %6772 = vmatmul.mubr.msk.f32.gmra.mrb[64].mxu1 %vm272_vm0, %v6677_v14 }
 0x78a   : > { %6774 = vmatprep.mubr.msk.f32.mxu1 %vm272_vm0, %v4320_v30 }
 0x78d   : > { %6775 = vmatmul.mubr.msk.f32.gmra.mrb[66].mxu1 %vm272_vm0, %v6684_v3 }
 0x78e   : > { %6777 = vmatprep.mubr.msk.f32.mxu1 %vm272_vm0, %v4407_v37 }
 0x791   : > { %6778 = vmatmul.mubr.msk.f32.gmra.mrb[68].mxu1 %vm272_vm0, %v6691_v51 }
 0x792   : > { %6780 = vmatprep.mubr.msk.f32.mxu1 %vm272_vm0, %v8338_v29 }
 0x795   : > { %6781 = vmatmul.mubr.msk.f32.gmra.mrb[70].mxu1 %vm272_vm0, %v8336_v38 }
 0x796   : > { %6783 = vmatprep.mubr.msk.f32.mxu1 %vm272_vm0, %v8342_v18 }
 0x799   : > { %6784 = vmatmul.mubr.msk.f32.gmra.mrb[72].mxu1 %vm272_vm0, %v8340_v17 }
 0x79a   : > { %6786 = vmatprep.mubr.msk.f32.mxu1 %vm272_vm0, %v8346_v5 }
 0x79d   : > { %6787 = vmatmul.mubr.msk.f32.gmra.mrb[74].mxu1 %vm272_vm0, %v8344_v23 }
 0x79e   : > { %6789 = vmatprep.mubr.msk.f32.mxu1 %vm272_vm0, %v8350_v25 }
 0x7a1   : > { %6790 = vmatmul.mubr.msk.f32.gmra.mrb[76].mxu1 %vm272_vm0, %v8348_v24 }
 0x7a2   : > { %6840 = vmatprep.mubr.msk.f32.mxu1 %vm272_vm0, %v4146_v6 }
 0x7a5   : > { %6841 = vmatmul.mubr.msk.f32.vlgmr.msra.gmra.mrb[78].mxu1 %vm272_vm0, %v6670_v49 }
 0x7a6   : > { %6843 = vmatprep.mubr.msk.f32.mxu1 %vm272_vm0, %v4233_v21  ;;  %v5723_v21 = vld [vmem:[%s8648_s4 + $0x48] sm:$0xff] }
 0x7a9   : > { %6844 = vmatmul.mubr.msk.f32.gmra.mrb[80].mxu1 %vm272_vm0, %v6677_v14 }
 0x7aa   : > { %6846 = vmatprep.mubr.msk.f32.mxu1 %vm272_vm0, %v4320_v30  ;;  %v5724_v30 = vld [vmem:[%s8648_s4 + $0x50] sm:$0xff] }
 0x7ad   : > { %6847 = vmatmul.mubr.msk.f32.gmra.mrb[82].mxu1 %vm272_vm0, %v6684_v3 }
 0x7ae   : > { %6849 = vmatprep.mubr.msk.f32.mxu1 %vm272_vm0, %v4407_v37 }
 0x7b1   : > { %6850 = vmatmul.mubr.msk.f32.gmra.mrb[84].mxu1 %vm272_vm0, %v6691_v51 }
 0x7b2   : > { %6852 = vmatprep.mubr.msk.f32.mxu1 %vm272_vm0, %v8338_v29 }
 0x7b5   : > { %6853 = vmatmul.mubr.msk.f32.gmra.mrb[86].mxu1 %vm272_vm0, %v8336_v38 }
 0x7b6   : > { %6855 = vmatprep.mubr.msk.f32.mxu1 %vm272_vm0, %v8342_v18 }
 0x7b9   : > { %6856 = vmatmul.mubr.msk.f32.gmra.mrb[88].mxu1 %vm272_vm0, %v8340_v17 }
 0x7ba   : > { %6858 = vmatprep.mubr.msk.f32.mxu1 %vm272_vm0, %v8346_v5 }
 0x7bd   : > { %6859 = vmatmul.mubr.msk.f32.gmra.mrb[90].mxu1 %vm272_vm0, %v8344_v23 }
 0x7be   : > { %6861 = vmatprep.mubr.msk.f32.mxu1 %vm272_vm0, %v8350_v25 }
 0x7c1   : > { %6862 = vmatmul.mubr.msk.f32.gmra.mrb[92].mxu1 %vm272_vm0, %v8348_v24 }
 0x834   : > { %v6698_v8 = vpop.f32.mrb[46].mxu1 }
 0x835   : > { %v4538_v38 = vpop.f32.mrb[47].mxu1 }
 0x836   : > { %v7172_v29 = vpack.c.bf16 %v6698_v8, %v4538_v38  ;;  %v5726_v38 = vld [vmem:[%s8648_s4 + $0x60] sm:$0xff] }
 0x838   : > { %7173 = vmatprep.subr.bf16.mxu0 %v7172_v29 }
 0x839   : > { %7175 = vmatpush3.bf16.msra.mxu0 %v7172_v29 }
 0x83c   : > { %v6701_v17 = vpop.f32.mrb[48].mxu1 }
 0x83d   : > { %v4548_v18 = vpop.f32.mrb[49].mxu1 }
 0x83e   : > { %v7176_v5 = vpack.c.bf16 %v6701_v17, %v4548_v18  ;;  %v5727_v18 = vld [vmem:[%s8648_s4 + $0x68] sm:$0xff] }
 0x840   : > { %v6704_v23 = vpop.f32.mrb[50].mxu1  ;;  %7177 = vmatprep.subr.bf16.mxu0 %v7176_v5 }
 0x841   : > { %v4558_v26 = vpop.f32.mrb[51].mxu1  ;;  %7179 = vmatpush3.bf16.msra.mxu0 %v7176_v5 }
 0x842   : > { %v7180_v25 = vpack.c.bf16 %v6704_v23, %v4558_v26  ;;  %v5728_v23 = vld [vmem:[%s8648_s4 + $0x70] sm:$0xff] }
 0x844   : > { %v6707_v48 = vpop.f32.mrb[52].mxu1  ;;  %7181 = vmatprep.subr.bf16.mxu0 %v7180_v25 }
 0x845   : > { %v4568_v24 = vpop.f32.mrb[53].mxu1  ;;  %7183 = vmatpush3.bf16.msra.mxu0 %v7180_v25 }
 0x846   : > { %v7184_v27 = vpack.c.bf16 %v6707_v48, %v4568_v24  ;;  %v5729_v48 = vld [vmem:[%s8648_s4 + $0x78] sm:$0xff] }
 0x848   : > { %v6710_v19 = vpop.f32.mrb[54].mxu1  ;;  %7185 = vmatprep.subr.bf16.mxu0 %v7184_v27 }
 0x849   : > { %v4578_v50 = vpop.f32.mrb[55].mxu1  ;;  %7187 = vmatpush3.bf16.msra.mxu0 %v7184_v27  ;;  %v5746_v27 = vld [vmem:[%s8648_s4 + $0x80] sm:$0xff] }
 0x84a   : > { %v7188_v47 = vpack.c.bf16 %v6710_v19, %v4578_v50 }
 0x84c   : > { %v6713_v32 = vpop.f32.mrb[56].mxu1  ;;  %7189 = vmatprep.subr.bf16.mxu0 %v7188_v47 }
 0x84d   : > { %v4588_v33 = vpop.f32.mrb[57].mxu1  ;;  %7191 = vmatpush3.bf16.msra.mxu0 %v7188_v47 }
 0x84e   : > { %v7192_v34 = vpack.c.bf16 %v6713_v32, %v4588_v33 }
 0x850   : > { %v6716_v35 = vpop.f32.mrb[58].mxu1  ;;  %7193 = vmatprep.subr.bf16.mxu0 %v7192_v34 }
 0x851   : > { %v4598_v52 = vpop.f32.mrb[59].mxu1  ;;  %7195 = vmatpush3.bf16.msra.mxu0 %v7192_v34 }
 0x852   : > { %v7196_v36 = vpack.c.bf16 %v6716_v35, %v4598_v52 }
 0x854   : > { %v6719_v39 = vpop.f32.mrb[60].mxu1  ;;  %7197 = vmatprep.subr.bf16.mxu0 %v7196_v36 }
 0x855   : > { %v4608_v45 = vpop.f32.mrb[61].mxu1  ;;  %7199 = vmatpush3.bf16.msra.mxu0 %v7196_v36 }
 0x856   : > { %v7200_v53 = vpack.c.bf16 %v6719_v39, %v4608_v45 }
 0x858   : > { %7201 = vmatprep.subr.bf16.mxu0 %v7200_v53  ;;  %v6770_v54 = vpop.f32.mrb[62].mxu1 }
 0x859   : > { %7203 = vmatpush3.bf16.msra.mxu0 %v7200_v53  ;;  %v4844_v55 = vpop.f32.mrb[63].mxu1 }
 0x85a   : > { %v7208_v56 = vpack.c.bf16 %v6770_v54, %v4844_v55  ;;  %v5747_v54 = vld [vmem:[%s8648_s4 + $0x88] sm:$0xff]  ;;  %v5748_v55 = vld [vmem:[%s8648_s4 + $0x90] sm:$0xff] }
 0x85c   : > { %v6773_v28 = vpop.f32.mrb[64].mxu1  ;;  %7209 = vmatprep.subr.bf16.mxu0 %v7208_v56  ;;  %6753 = vmatmul.mubr.f32.vlgmr.msra.gmra.mrb[82].mxu0 %v4618_v31  ;;  %v5749_v31 = vld [vmem:[%s8648_s4 + $0x98] sm:$0xff] }
 0x85d   : > { %v4854_v0 = vpop.f32.mrb[65].mxu1  ;;  %7211 = vmatpush3.bf16.msra.mxu0 %v7208_v56  ;;  %6755 = vmatprep.mubr.f32.mxu0 %v4619_v57  ;;  %v5750_v56 = vld [vmem:[%s8648_s4 + $0xa0] sm:$0xff]  ;;  %v5751_v57 = vld [vmem:[%s8648_s4 + $0xa8] sm:$0xff] }
 0x85e   : > { %v7212_v42 = vpack.c.bf16 %v6773_v28, %v4854_v0  ;;  %v5752_v28 = vld [vmem:[%s8648_s4 + $0xb0] sm:$0xff]  ;;  %v5753_v0 = vld [vmem:[%s8648_s4 + $0xb8] sm:$0xff] }
 0x860   : > { %v6776_v46 = vpop.f32.mrb[66].mxu1  ;;  %7213 = vmatprep.subr.bf16.mxu0 %v7212_v42  ;;  %6756 = vmatmul.mubr.f32.gmra.mrb[84].mxu0 %v4620_v41  ;;  %v4733_v41 = vpop.permute.xlu1 %4732 }
 0x861   : > { %v4864_v58 = vpop.f32.mrb[67].mxu1  ;;  %7215 = vmatpush3.bf16.msra.mxu0 %v7212_v42  ;;  %6758 = vmatprep.mubr.f32.mxu0 %v4621_v44  ;;  %v4738_v44 = vpop.permute.xlu0 %4737 }
 0x862   : > { %v7216_v43 = vpack.c.bf16 %v6776_v46, %v4864_v58 }
 0x864   : > { %v6779_v60 = vpop.f32.mrb[68].mxu1  ;;  %7217 = vmatprep.subr.bf16.mxu0 %v7216_v43  ;;  %6759 = vmatmul.mubr.f32.gmra.mrb[86].mxu0 %v4622_v59  ;;  %v4743_v42 = vpop.permute.xlu1 %4742 }
 0x865   : > { %v4874_v62 = vpop.f32.mrb[69].mxu1  ;;  %7219 = vmatpush3.bf16.msra.mxu0 %v7216_v43  ;;  %6761 = vmatprep.mubr.f32.mxu0 %v4623_v40 }
 0x866   : > { %v7220_v9 = vpack.c.bf16 %v6779_v60, %v4874_v62 }
 0x868   : > { %v6782_v2 = vpop.f32.mrb[70].mxu1  ;;  %7221 = vmatprep.subr.bf16.mxu0 %v7220_v9  ;;  %6762 = vmatmul.mubr.f32.gmra.mrb[88].mxu0 %v4624_v63  ;;  %v4748_v46 = vpop.permute.xlu1 %4747 }
 0x869   : > { %v4884_v11 = vpop.f32.mrb[71].mxu1  ;;  %7223 = vmatpush3.bf16.msra.mxu0 %v7220_v9  ;;  %6824 = vmatprep.mubr.f32.mxu0 %v5722_v10 }
 0x86a   : > { %v7224_v4 = vpack.c.bf16 %v6782_v2, %v4884_v11  ;;  %v4753_v2 = vpop.permute.xlu0 %4752 }
 0x86c   : > { %v6785_v1 = vpop.f32.mrb[72].mxu1  ;;  %7225 = vmatprep.subr.bf16.mxu0 %v7224_v4  ;;  %v4758_v9 = vpop.permute.xlu1 %4757 }
 0x86d   : > { %v4894_v12 = vpop.f32.mrb[73].mxu1  ;;  %7227 = vmatpush3.bf16.msra.mxu0 %v7224_v4 }
 0x86e   : > { %v7228_v13 = vpack.c.bf16 %v6785_v1, %v4894_v12 }
 0x870   : > { %v6788_v16 = vpop.f32.mrb[74].mxu1  ;;  %7229 = vmatprep.subr.bf16.mxu0 %v7228_v13 }
 0x871   : > { %v4904_v15 = vpop.f32.mrb[75].mxu1  ;;  %7231 = vmatpush3.bf16.msra.mxu0 %v7228_v13  ;;  %v4768_v13 = vpop.permute.xlu1 %4767 }
 0x872   : > { %v7232_v22 = vpack.c.bf16 %v6788_v16, %v4904_v15  ;;  %v4763_v15 = vpop.permute.xlu0 %4762 }
 0x874   : > { %v6791_v20 = vpop.f32.mrb[76].mxu1  ;;  %7233 = vmatprep.subr.bf16.mxu0 %v7232_v22 }
 0x875   : > { %v4914_v61 = vpop.f32.mrb[77].mxu1  ;;  %7235 = vmatpush3.bf16.msra.mxu0 %v7232_v22 }
 0x876   : > { %v7236_v49 = vpack.c.bf16 %v6791_v20, %v4914_v61 }
 0x878   : > { %7237 = vmatprep.subr.bf16.mxu0 %v7236_v49  ;;  %v6842_v6 = vpop.f32.mrb[78].mxu1 }
 0x879   : > { %7239 = vmatpush3.bf16.msra.mxu0 %v7236_v49  ;;  %v5111_v14 = vpop.f32.mrb[79].mxu1 }
 0x87a   : > { %v7244_v3 = vpack.c.bf16 %v6842_v6, %v5111_v14 }
 0x87c   : > { %v6845_v51 = vpop.f32.mrb[80].mxu1  ;;  %7245 = vmatprep.subr.bf16.mxu0 %v7244_v3  ;;  %6825 = vmatmul.mubr.f32.vlgmr.msra.gmra.mrb[82].mxu0 %v5723_v21 }
 0x87d   : > { %v5121_v37 = vpop.f32.mrb[81].mxu1  ;;  %7247 = vmatpush3.bf16.msra.mxu0 %v7244_v3  ;;  %6827 = vmatprep.mubr.f32.mxu0 %v5724_v30 }
 0x87e   : > { %v7248_v8 = vpack.c.bf16 %v6845_v51, %v5121_v37 }
 0x880   : > { %v6848_v29 = vpop.f32.mrb[82].mxu1  ;;  %7249 = vmatprep.subr.bf16.mxu0 %v7248_v8  ;;  %6828 = vmatmul.mubr.f32.gmra.mrb[84].mxu0 %v5725_v7 }
 0x881   : > { %v5131_v17 = vpop.f32.mrb[83].mxu1  ;;  %7251 = vmatpush3.bf16.msra.mxu0 %v7248_v8  ;;  %6830 = vmatprep.mubr.f32.mxu0 %v5726_v38 }
 0x882   : > { %v7252_v5 = vpack.c.bf16 %v6848_v29, %v5131_v17 }
 0x884   : > { %v6851_v26 = vpop.f32.mrb[84].mxu1  ;;  %7253 = vmatprep.subr.bf16.mxu0 %v7252_v5  ;;  %6831 = vmatmul.mubr.f32.gmra.mrb[86].mxu0 %v5727_v18 }
 0x885   : > { %v5141_v25 = vpop.f32.mrb[85].mxu1  ;;  %7255 = vmatpush3.bf16.msra.mxu0 %v7252_v5  ;;  %6833 = vmatprep.mubr.f32.mxu0 %v5728_v23 }
 0x886   : > { %v7256_v24 = vpack.c.bf16 %v6851_v26, %v5141_v25 }
 0x888   : > { %v6854_v19 = vpop.f32.mrb[86].mxu1  ;;  %7257 = vmatprep.subr.bf16.mxu0 %v7256_v24  ;;  %6834 = vmatmul.mubr.f32.gmra.mrb[88].mxu0 %v5729_v48 }
 0x889   : > { %v5151_v50 = vpop.f32.mrb[87].mxu1  ;;  %7259 = vmatpush3.bf16.msra.mxu0 %v7256_v24  ;;  %6896 = vmatprep.mubr.f32.mxu0 %v5746_v27 }
 0x88a   : > { %v7260_v47 = vpack.c.bf16 %v6854_v19, %v5151_v50 }
 0x88c   : > { %v6857_v32 = vpop.f32.mrb[88].mxu1  ;;  %7261 = vmatprep.subr.bf16.mxu0 %v7260_v47 }
 0x88d   : > { %v5161_v33 = vpop.f32.mrb[89].mxu1  ;;  %7263 = vmatpush3.bf16.msra.mxu0 %v7260_v47 }
 0x88e   : > { %v7264_v34 = vpack.c.bf16 %v6857_v32, %v5161_v33 }
 0x890   : > { %v6860_v35 = vpop.f32.mrb[90].mxu1  ;;  %7265 = vmatprep.subr.bf16.mxu0 %v7264_v34 }
 0x891   : > { %v5171_v52 = vpop.f32.mrb[91].mxu1  ;;  %7267 = vmatpush3.bf16.msra.mxu0 %v7264_v34 }
 0x892   : > { %v7268_v36 = vpack.c.bf16 %v6860_v35, %v5171_v52 }
 0x894   : > { %v6863_v39 = vpop.f32.mrb[92].mxu1  ;;  %7269 = vmatprep.subr.bf16.mxu0 %v7268_v36 }
 0x895   : > { %v5181_v45 = vpop.f32.mrb[93].mxu1  ;;  %7271 = vmatpush3.bf16.msra.mxu0 %v7268_v36 }
 0x896   : > { %v7272_v53 = vpack.c.bf16 %v6863_v39, %v5181_v45 }
 0x898   : > { %7273 = vmatprep.subr.bf16.mxu0 %v7272_v53 }
 0x899   : > { %7275 = vmatpush3.bf16.msra.mxu0 %v7272_v53 }
 0x89c   : > { %6897 = vmatmul.mubr.f32.vlgmr.msra.gmra.mrb[82].mxu0 %v5747_v54 }
 0x89d   : > { %6899 = vmatprep.mubr.f32.mxu0 %v5748_v55 }
 0x8a0   : > { %6900 = vmatmul.mubr.f32.gmra.mrb[84].mxu0 %v5749_v31 }
 0x8a1   : > { %6902 = vmatprep.mubr.f32.mxu0 %v5750_v56 }
 0x8a4   : > { %6903 = vmatmul.mubr.f32.gmra.mrb[86].mxu0 %v5751_v57 }
 0x8a5   : > { %6905 = vmatprep.mubr.f32.mxu0 %v5752_v28 }
 0x8a8   : > { %6906 = vmatmul.mubr.f32.gmra.mrb[88].mxu0 %v5753_v0 }
 0x96f   : > { %v6898_v58 = vpop.f32.mrb[82].mxu0 }
 0x970   : > { %v7300_v59 = vadd.f32 %v6898_v58, %v4738_v44  ;;  %v5265_v43 = vpop.f32.mrb[83].mxu0 }
 0x971   : > { %v7301_v40 = vadd.f32 %v5265_v43, %v4733_v41 }
 0x972   : > { %5313 = vst.msk [vmem:[%s244_s14 + $0x8] sm:$0xff] %vm272_vm0, %v7300_v59 }
 0x973   : > { %5312 = vst.msk [vmem:[%s244_s14] sm:$0xff] %vm272_vm0, %v7301_v40  ;;  %v6901_v60 = vpop.f32.mrb[84].mxu0 }
 0x974   : > { %v7302_v62 = vadd.f32 %v6901_v60, %v4748_v46  ;;  %v5275_v63 = vpop.f32.mrb[85].mxu0 }
 0x975   : > { %v7303_v10 = vadd.f32 %v5275_v63, %v4743_v42 }
 0x976   : > { %5315 = vst.msk [vmem:[%s244_s14 + $0x18] sm:$0xff] %vm272_vm0, %v7302_v62 }
 0x977   : > { %5314 = vst.msk [vmem:[%s244_s14 + $0x10] sm:$0xff] %vm272_vm0, %v7303_v10  ;;  %v6904_v11 = vpop.f32.mrb[86].mxu0 }
 0x978   : > { %v7304_v4 = vadd.f32 %v6904_v11, %v4758_v9  ;;  %v5285_v1 = vpop.f32.mrb[87].mxu0 }
 0x979   : > { %v7305_v12 = vadd.f32 %v5285_v1, %v4753_v2 }
 0x97a   : > { %5317 = vst.msk [vmem:[%s244_s14 + $0x28] sm:$0xff] %vm272_vm0, %v7304_v4 }
 0x97b   : > { %5316 = vst.msk [vmem:[%s244_s14 + $0x20] sm:$0xff] %vm272_vm0, %v7305_v12  ;;  %v6907_v16 = vpop.f32.mrb[88].mxu0 }
 0x97c   : > { %v7306_v22 = vadd.f32 %v6907_v16, %v4768_v13  ;;  %v5295_v20 = vpop.f32.mrb[89].mxu0 }
 0x97d   : > { %v7307_v61 = vadd.f32 %v5295_v20, %v4763_v15 }
 0x97e   : > { %5319 = vst.msk [vmem:[%s244_s14 + $0x38] sm:$0xff] %vm272_vm0, %v7306_v22 }
 0x97f   : > { %5318 = vst.msk [vmem:[%s244_s14 + $0x30] sm:$0xff] %vm272_vm0, %v7307_v61 }
 0x980   : > { %7495 = shalt.err (!%p7492_p3)
}
 0x981   : > { %s7496_s9 = scalar_lea.hbm %s8595_s19, 1024  ;;  %s7500_s12 = scalar_lea.hbm %s8650_s6, 2048 }
 0x982   : > { %p7497_p4 = scmp.ne.s32.totalorder %s8595_s19, %s7496_s9  ;;  %p7501_p9 = scmp.lt.u32.totalorder %s8595_s19, %s8650_s6 }
 0x983   : > { %p7502_p10 = scmp.lt.u32.totalorder %s7500_s12, %s7496_s9  ;;  %p7504_p12 = scmp.lt.u32.totalorder %s7496_s9, %s8595_s19 }
 0x984   : > { %p7498_p7 = pnand %p7497_p4, %p7623_p5 }
 0x985   : > { %p7503_p11 = por %p7502_p10, %p7501_p9 }
 0x986   : > { %p7499_p8 = pneg %p7498_p7 }
 0x987   : > { %p7505_p13 = por %p7504_p12, %p7503_p11 }
 0x989   : > { %p7506_p0 = pnand %p7505_p13, %p7499_p8 }
 0x98b   : > { %7509 = shalt.err (!%p7506_p0)
}
 0x98c   : > { %s7548_s15 = smov 128   ;;  %s7549_s17 = smov 8  }
 0x98d   : > { %7373 = dma.vmem_to_hbm [thread:$0]  (%p7623_p5), %s8597_s16, 1024, %s8595_s19, %s8603_s25, %s7548_s15, %s7548_s15, %s7549_s17  }
 0x98e PF: > { %p7379_p1 = scmp.ge.s32.totalorder %s7544_s24, 2  ;;  %s5349_s18 = sand.u32 1, %s7532_s21  }
 0x98f   : > { %s5350_s20 = scalar_lea.sflag [#allocation3], %s5349_s18 }
 0x990   : > { %p7376_p2 = pnand %p7379_p1, %p7627_p6 }
 0x992   : > { %7527 = dma.done.wait (!%p7376_p2), %s5350_s20, 1024  }
 0x993   : > { %7529 = vsyncadd (!%p7376_p2), %s5350_s20, 4294966272  ;;  %p16_p3 = scmp.ge.s32.totalorder %s7610_s27, 4   ;;  %s8655_s21 = smov %s7536_s22 }
 0x994   : > { %s8656_s22 = smov %s7540_s23  ;;  %s8657_s23 = smov %s7621_s30 }
 0x995   : > { %s8658_s24 = smov %s7610_s27  ;;  %18 = sbr.rel (!%p16_p3) target bundleno = 3 (0x3), region = 93 }
 0x99c   :  { %5355 = vsyncpa [#allocation3], 1 }
 0x99d   :  { %5357 = vsyncpa [#allocation3 + $0x1], 1 }

</bundles_post_ra>
